<compile_context>
chip_gen: v7x
topology: tpu7x:2x2x1
jax: 0.10.0
libtpu: 0.0.40
codegen_flags: <defaults>
</compile_context>

<pallas_src>
import jax
import jax.numpy as jnp
from jax import lax
from jax.experimental import pallas as pl
from jax.experimental.pallas import tpu as pltpu


# ----------------------------- Pallas kernel --------------------------------


def dkt_kernel(xg0_ref, qn_ref, whh0_ref, w1_ref, b1_ref, wfc_ref, bfc_ref,
               s_ref, h_scratch):
    T, Bt, G4 = xg0_ref.shape          # (time, batch-tile, 4H)
    H = whh0_ref.shape[0]
    Qn = wfc_ref.shape[1]

    # Loop-invariant operands hoisted out of the recurrence.
    whh0 = whh0_ref[...]                                   # (H, 4H)
    w1 = w1_ref[...]                                       # (2H, 4H)  [W_ih1^T ; W_hh1^T]
    b1 = jnp.broadcast_to(b1_ref[...], (Bt, G4))           # hoisted broadcast

    def gates_to_hc(g, c):
        i = jax.nn.sigmoid(g[:, 0:H])
        f = jax.nn.sigmoid(g[:, H:2 * H])
        gg = jnp.tanh(g[:, 2 * H:3 * H])
        o = jax.nn.sigmoid(g[:, 3 * H:4 * H])
        c_new = f * c + i * gg
        h_new = o * jnp.tanh(c_new)
        return h_new, c_new

    def step(t, carry):
        h0, c0, h1, c1 = carry
        # Layer 0: x @ W_ih0^T + b0 is precomputed (xg0); add recurrent term only.
        g0 = xg0_ref[t] + jnp.dot(h0.astype(whh0.dtype), whh0,
                                  preferred_element_type=jnp.float32)
        h0, c0 = gates_to_hc(g0, c0)
        # Layer 1: single fused matmul of [h0 | h1_prev] against [W_ih1^T ; W_hh1^T].
        hh = jnp.concatenate([h0, h1], axis=1).astype(w1.dtype)
        g1 = jnp.dot(hh, w1, preferred_element_type=jnp.float32) + b1
        h1, c1 = gates_to_hc(g1, c1)
        h_scratch[t] = h1                                  # contiguous (Bt, H) store
        return h0, c0, h1, c1

    z = jnp.zeros((Bt, H), jnp.float32)
    lax.fori_loop(0, T, step, (z, z, z, z),
                  unroll=True if T <= 32 else 8)

    # FC head on the whole hidden slab: P = sigmoid(tanh(H1) @ W_fc^T + b_fc).
    wfc = wfc_ref[...]                                     # (H, Qn)
    hf = jnp.tanh(h_scratch[...]).reshape(T * Bt, H).astype(wfc.dtype)
    p = jax.nn.sigmoid(
        jnp.dot(hf, wfc, preferred_element_type=jnp.float32) + bfc_ref[...])
    p = p.reshape(T, Bt, Qn)

    # s[tau, b] = P[tau, b, Q[b, tau+1]]  (== sum(onehot(Q[:,1:]) * P[:,:-1], -1))
    qn = qn_ref[...]                                       # (T-1, Bt) int32
    ids = lax.broadcasted_iota(jnp.int32, (T - 1, Bt, Qn), 2)
    mask = (ids == qn[:, :, None]).astype(jnp.float32)
    s_ref[...] = jnp.sum(p[:T - 1] * mask, axis=2)         # (T-1, Bt) lane-dense


# ------------------------------ host wrapper --------------------------------


def _vmem_bytes_estimate(T, Bt, H, q):
    f = 4
    xg0 = T * Bt * 4 * H * f
    qn = (T - 1) * Bt * 4
    out = (T - 1) * Bt * f
    weights = (H * 4 * H + 2 * H * 4 * H + 4 * H + H * q + q) * f
    scratch = T * Bt * H * f
    head = 3 * T * Bt * max(q, 128) * f        # logits / P / mask temporaries (lane-padded)
    return 2 * (xg0 + qn + out + weights) + scratch + head


def _pick_batch_tile(B, T, H, q, budget_bytes=24 << 20):
    # Lane-dense tiles (multiple of 128) keep every BlockSpec last-dim legal and
    # make the (T-1, B_tile) output stores unmasked.  Small / odd batches run as
    # a single resident program (grid of 1).
    for bt in (256, 128):
        if B % bt == 0 and _vmem_bytes_estimate(T, bt, H, q) <= budget_bytes:
            return bt
    return B


def dkt_forward(X, Q, params, q_num, h_num, *, matmul_dtype=jnp.float32):
    """DKT forward.  X, Q: (B, T) int32.  Returns (B, T-1, 3) float32."""
    B, T = X.shape
    H = h_num
    f32 = jnp.float32

    # --- parameter repacking (transposed to right-multiply form) ---
    wih0_t = params["w_ih_l0"].T.astype(f32)                           # (3q, 4H)
    b0 = (params["b_ih_l0"] + params["b_hh_l0"]).astype(f32)           # (4H,)
    whh0_t = params["w_hh_l0"].T.astype(matmul_dtype)                  # (H, 4H)
    w1 = jnp.concatenate([params["w_ih_l1"].T, params["w_hh_l1"].T],
                         axis=0).astype(matmul_dtype)                  # (2H, 4H)
    b1 = (params["b_ih_l1"] + params["b_hh_l1"])[None, :].astype(f32)  # (1, 4H)
    wfc_t = params["w_fc"].T.astype(matmul_dtype)                      # (H, q)
    bfc = params["b_fc"][None, :].astype(f32)                          # (1, q)

    # --- one-hot elimination: pure gathers, done as XLA glue ---
    # onehot(X) @ W_ih0^T  ==  row gather of W_ih0^T  -> layer-0 pre-activations.
    xg0 = jnp.take(wih0_t, X, axis=0) + b0                             # (B, T, 4H)
    xg0 = jnp.transpose(xg0, (1, 0, 2))                                # (T, B, 4H) time-major
    qn = Q[:, 1:].T.astype(jnp.int32)                                  # (T-1, B) next-question ids

    Bt = _pick_batch_tile(B, T, H, q_num)
    grid = (B // Bt,)
    vmem_limit = int(min(max(4 * _vmem_bytes_estimate(T, Bt, H, q_num), 8 << 20),
                         32 << 20))

    s = pl.pallas_call(
        dkt_kernel,
        out_shape=jax.ShapeDtypeStruct((T - 1, B), f32),
        grid_spec=pltpu.PrefetchScalarGridSpec(
            num_scalar_prefetch=0,
            grid=grid,
            in_specs=[
                pl.BlockSpec((T, Bt, 4 * H), lambda i: (0, i, 0)),     # xg0
                pl.BlockSpec((T - 1, Bt), lambda i: (0, i)),           # next-question ids
                pl.BlockSpec((H, 4 * H), lambda i: (0, 0)),            # W_hh0^T
                pl.BlockSpec((2 * H, 4 * H), lambda i: (0, 0)),        # [W_ih1^T ; W_hh1^T]
                pl.BlockSpec((1, 4 * H), lambda i: (0, 0)),            # b1
                pl.BlockSpec((H, q_num), lambda i: (0, 0)),            # W_fc^T
                pl.BlockSpec((1, q_num), lambda i: (0, 0)),            # b_fc
            ],
            out_specs=pl.BlockSpec((T - 1, Bt), lambda i: (0, i)),
            scratch_shapes=[pltpu.VMEM((T, Bt, H), f32)],
        ),
        compiler_params=pltpu.CompilerParams(
            dimension_semantics=("parallel",),
            vmem_limit_bytes=vmem_limit,
        ),
    )(xg0, qn, whh0_t, w1, b1, wfc_t, bfc)

    # Trivial Linear(1 -> 3) done in XLA (keeps the kernel output lane-dense).
    s_bt = s.T                                                         # (B, T-1)
    w_cls = params["w_cls"].reshape(3).astype(f32)
    b_cls = params["b_cls"].astype(f32)
    return s_bt[:, :, None] * w_cls + b_cls                            # (B, T-1, 3)


# --------------------------- pure-JAX reference ------------------------------


def dkt_reference(X, Q, params, q_num, h_num):
    f32 = jnp.float32
    x_oh = jax.nn.one_hot(X, 3 * q_num, dtype=f32)
    q_oh = jax.nn.one_hot(Q, q_num, dtype=f32)

    def lstm_layer(inp, w_ih, w_hh, b_ih, b_hh):  # inp time-major (T, B, F)
        H = w_hh.shape[1]

        def cell(carry, x_t):
            h, c = carry
            g = x_t @ w_ih.T + b_ih + h @ w_hh.T + b_hh
            i = jax.nn.sigmoid(g[:, 0:H])
            f = jax.nn.sigmoid(g[:, H:2 * H])
            gg = jnp.tanh(g[:, 2 * H:3 * H])
            o = jax.nn.sigmoid(g[:, 3 * H:4 * H])
            c = f * c + i * gg
            h = o * jnp.tanh(c)
            return (h, c), h

        z = jnp.zeros((inp.shape[1], H), f32)
        _, hs = lax.scan(cell, (z, z), inp)
        return hs

    h0 = lstm_layer(jnp.transpose(x_oh, (1, 0, 2)),
                    params["w_ih_l0"], params["w_hh_l0"],
                    params["b_ih_l0"], params["b_hh_l0"])
    h1 = lstm_layer(h0, params["w_ih_l1"], params["w_hh_l1"],
                    params["b_ih_l1"], params["b_hh_l1"])
    h1 = jnp.transpose(h1, (1, 0, 2))                                  # (B, T, H)
    P = jax.nn.sigmoid(jnp.tanh(h1) @ params["w_fc"].T + params["b_fc"])
    s = jnp.sum(q_oh[:, 1:] * P[:, :-1], axis=2)                       # (B, T-1)
    return s[..., None] * params["w_cls"].reshape(3) + params["b_cls"]


def init_params(key, q_num, h_num):
    def u(k, shape):
        return jax.random.uniform(k, shape, jnp.float32, -0.1, 0.1)

    ks = jax.random.split(key, 12)
    return {
        "w_ih_l0": u(ks[0], (4 * h_num, 3 * q_num)),
        "w_hh_l0": u(ks[1], (4 * h_num, h_num)),
        "b_ih_l0": u(ks[2], (4 * h_num,)),
        "b_hh_l0": u(ks[3], (4 * h_num,)),
        "w_ih_l1": u(ks[4], (4 * h_num, h_num)),
        "w_hh_l1": u(ks[5], (4 * h_num, h_num)),
        "b_ih_l1": u(ks[6], (4 * h_num,)),
        "b_hh_l1": u(ks[7], (4 * h_num,)),
        "w_fc":    u(ks[8], (q_num, h_num)),
        "b_fc":    u(ks[9], (q_num,)),
        "w_cls":   u(ks[10], (3, 1)),
        "b_cls":   u(ks[11], (3,)),
    }


if __name__ == "__main__":
    q_num, h_num = 8, 32
    B, T = 2, 8

    key = jax.random.PRNGKey(0)
    kx, kq, kp = jax.random.split(key, 3)
    X = jax.random.randint(kx, (B, T), 0, 3 * q_num, dtype=jnp.int32)
    Q = jax.random.randint(kq, (B, T), 0, q_num, dtype=jnp.int32)
    params = init_params(kp, q_num, h_num)

    fwd = jax.jit(dkt_forward, static_argnums=(3, 4))
    out = jax.block_until_ready(fwd(X, Q, params, q_num, h_num))
    assert out.shape == (B, T - 1, 3)

    ref = dkt_reference(X, Q, params, q_num, h_num)
    err = float(jnp.max(jnp.abs(out - ref)))
    assert err < 1e-4, f"max abs error vs reference: {err}"

    print("KERNEL_OK")
</pallas_src>

<mosaic_0001>
module attributes {stable_mosaic.version = 11 : i64} {
  func.func @dkt_kernel(%arg0: i32, %arg1: memref<8x2x128xf32, #tpu.memory_space<vmem>>, %arg2: memref<7x2xi32, #tpu.memory_space<vmem>>, %arg3: memref<32x128xf32, #tpu.memory_space<vmem>>, %arg4: memref<64x128xf32, #tpu.memory_space<vmem>>, %arg5: memref<1x128xf32, #tpu.memory_space<vmem>>, %arg6: memref<32x8xf32, #tpu.memory_space<vmem>>, %arg7: memref<1x8xf32, #tpu.memory_space<vmem>>, %arg8: memref<7x2xf32, #tpu.memory_space<vmem>>, %arg9: memref<8x2x32xf32, #tpu.memory_space<vmem>>) attributes {dimension_semantics = [#tpu.dimension_semantics<parallel>], iteration_bounds = array<i64: 1>, scalar_prefetch = 0 : i64, scratch_operands = 1 : i64, tpu.core_type = #tpu.core_type<tc>, window_params = [{transform_indices = @transform_0, window_bounds = array<i64: 8, 2, 128>}, {transform_indices = @transform_1, window_bounds = array<i64: 7, 2>}, {pipeline_mode = #tpu.pipeline_mode<synchronous>, transform_indices = @transform_2, window_bounds = array<i64: 32, 128>}, {pipeline_mode = #tpu.pipeline_mode<synchronous>, transform_indices = @transform_3, window_bounds = array<i64: 64, 128>}, {pipeline_mode = #tpu.pipeline_mode<synchronous>, transform_indices = @transform_4, window_bounds = array<i64: 1, 128>}, {pipeline_mode = #tpu.pipeline_mode<synchronous>, transform_indices = @transform_5, window_bounds = array<i64: 32, 8>}, {pipeline_mode = #tpu.pipeline_mode<synchronous>, transform_indices = @transform_6, window_bounds = array<i64: 1, 8>}, {transform_indices = @transform_7, window_bounds = array<i64: 7, 2>}]} {
    %c0 = arith.constant 0 : index
    %c0_0 = arith.constant 0 : index
    %0 = vector.load %arg3[%c0, %c0_0] : memref<32x128xf32, #tpu.memory_space<vmem>>, vector<32x128xf32>
    %c0_1 = arith.constant 0 : index
    %c0_2 = arith.constant 0 : index
    %1 = vector.load %arg4[%c0_1, %c0_2] : memref<64x128xf32, #tpu.memory_space<vmem>>, vector<64x128xf32>
    %c0_3 = arith.constant 0 : index
    %c0_4 = arith.constant 0 : index
    %2 = vector.load %arg5[%c0_3, %c0_4] : memref<1x128xf32, #tpu.memory_space<vmem>>, vector<1x128xf32>
    %3 = vector.shape_cast %2 : vector<1x128xf32> to vector<1x128xf32>
    %4 = vector.broadcast %3 : vector<1x128xf32> to vector<2x128xf32>
    %cst = arith.constant 0.000000e+00 : f32
    %5 = vector.broadcast %cst : f32 to vector<2x32xf32>
    %c0_i32 = arith.constant 0 : i32
    %6 = arith.index_cast %c0_i32 : i32 to index
    %c0_5 = arith.constant 0 : index
    %c0_6 = arith.constant 0 : index
    %7 = vector.load %arg1[%6, %c0_5, %c0_6] : memref<8x2x128xf32, #tpu.memory_space<vmem>>, vector<1x2x128xf32>
    %8 = vector.shape_cast %7 : vector<1x2x128xf32> to vector<2x128xf32>
    %cst_7 = arith.constant dense<0.000000e+00> : vector<2x128xf32>
    %9 = tpu.matmul %5, %0, %cst_7 {dimension_numbers = #tpu.dot_dimension_numbers<[1], [0], [0], [1], [0, 0, 1, 1], [], []>} : vector<2x32xf32>, vector<32x128xf32>, vector<2x128xf32> -> vector<2x128xf32>
    %10 = arith.addf %8, %9 : vector<2x128xf32>
    %11 = vector.extract_strided_slice %10 {offsets = [0, 0], sizes = [2, 32], strides = [1, 1]} : vector<2x128xf32> to vector<2x32xf32>
    %12 = arith.negf %11 : vector<2x32xf32>
    %13 = math.exp %12 : vector<2x32xf32>
    %cst_8 = arith.constant 1.000000e+00 : f32
    %14 = vector.broadcast %cst_8 : f32 to vector<2x32xf32>
    %15 = arith.addf %14, %13 : vector<2x32xf32>
    %16 = arith.divf %14, %15 : vector<2x32xf32>
    %17 = vector.extract_strided_slice %10 {offsets = [0, 32], sizes = [2, 32], strides = [1, 1]} : vector<2x128xf32> to vector<2x32xf32>
    %18 = arith.negf %17 : vector<2x32xf32>
    %19 = math.exp %18 : vector<2x32xf32>
    %cst_9 = arith.constant 1.000000e+00 : f32
    %20 = vector.broadcast %cst_9 : f32 to vector<2x32xf32>
    %21 = arith.addf %20, %19 : vector<2x32xf32>
    %22 = arith.divf %20, %21 : vector<2x32xf32>
    %23 = vector.extract_strided_slice %10 {offsets = [0, 64], sizes = [2, 32], strides = [1, 1]} : vector<2x128xf32> to vector<2x32xf32>
    %24 = math.tanh %23 : vector<2x32xf32>
    %25 = vector.extract_strided_slice %10 {offsets = [0, 96], sizes = [2, 32], strides = [1, 1]} : vector<2x128xf32> to vector<2x32xf32>
    %26 = arith.negf %25 : vector<2x32xf32>
    %27 = math.exp %26 : vector<2x32xf32>
    %cst_10 = arith.constant 1.000000e+00 : f32
    %28 = vector.broadcast %cst_10 : f32 to vector<2x32xf32>
    %29 = arith.addf %28, %27 : vector<2x32xf32>
    %30 = arith.divf %28, %29 : vector<2x32xf32>
    %31 = arith.mulf %22, %5 : vector<2x32xf32>
    %32 = arith.mulf %16, %24 : vector<2x32xf32>
    %33 = arith.addf %31, %32 : vector<2x32xf32>
    %34 = math.tanh %33 : vector<2x32xf32>
    %35 = arith.mulf %30, %34 : vector<2x32xf32>
    %36 = tpu.concatenate %35, %5 in 1 : vector<2x32xf32>, vector<2x32xf32> -> vector<2x64xf32>
    %cst_11 = arith.constant dense<0.000000e+00> : vector<2x128xf32>
    %37 = tpu.matmul %36, %1, %cst_11 {dimension_numbers = #tpu.dot_dimension_numbers<[1], [0], [0], [1], [0, 0, 1, 1], [], []>} : vector<2x64xf32>, vector<64x128xf32>, vector<2x128xf32> -> vector<2x128xf32>
    %38 = arith.addf %37, %4 : vector<2x128xf32>
    %39 = vector.extract_strided_slice %38 {offsets = [0, 0], sizes = [2, 32], strides = [1, 1]} : vector<2x128xf32> to vector<2x32xf32>
    %40 = arith.negf %39 : vector<2x32xf32>
    %41 = math.exp %40 : vector<2x32xf32>
    %cst_12 = arith.constant 1.000000e+00 : f32
    %42 = vector.broadcast %cst_12 : f32 to vector<2x32xf32>
    %43 = arith.addf %42, %41 : vector<2x32xf32>
    %44 = arith.divf %42, %43 : vector<2x32xf32>
    %45 = vector.extract_strided_slice %38 {offsets = [0, 32], sizes = [2, 32], strides = [1, 1]} : vector<2x128xf32> to vector<2x32xf32>
    %46 = arith.negf %45 : vector<2x32xf32>
    %47 = math.exp %46 : vector<2x32xf32>
    %cst_13 = arith.constant 1.000000e+00 : f32
    %48 = vector.broadcast %cst_13 : f32 to vector<2x32xf32>
    %49 = arith.addf %48, %47 : vector<2x32xf32>
    %50 = arith.divf %48, %49 : vector<2x32xf32>
    %51 = vector.extract_strided_slice %38 {offsets = [0, 64], sizes = [2, 32], strides = [1, 1]} : vector<2x128xf32> to vector<2x32xf32>
    %52 = math.tanh %51 : vector<2x32xf32>
    %53 = vector.extract_strided_slice %38 {offsets = [0, 96], sizes = [2, 32], strides = [1, 1]} : vector<2x128xf32> to vector<2x32xf32>
    %54 = arith.negf %53 : vector<2x32xf32>
    %55 = math.exp %54 : vector<2x32xf32>
    %cst_14 = arith.constant 1.000000e+00 : f32
    %56 = vector.broadcast %cst_14 : f32 to vector<2x32xf32>
    %57 = arith.addf %56, %55 : vector<2x32xf32>
    %58 = arith.divf %56, %57 : vector<2x32xf32>
    %59 = arith.mulf %50, %5 : vector<2x32xf32>
    %60 = arith.mulf %44, %52 : vector<2x32xf32>
    %61 = arith.addf %59, %60 : vector<2x32xf32>
    %62 = math.tanh %61 : vector<2x32xf32>
    %63 = arith.mulf %58, %62 : vector<2x32xf32>
    %64 = arith.index_cast %c0_i32 : i32 to index
    %c0_15 = arith.constant 0 : index
    %c0_16 = arith.constant 0 : index
    %65 = vector.load %arg9[%64, %c0_15, %c0_16] : memref<8x2x32xf32, #tpu.memory_space<vmem>>, vector<1x2x32xf32>
    %66 = vector.shape_cast %65 : vector<1x2x32xf32> to vector<2x32xf32>
    %67 = vector.shape_cast %63 : vector<2x32xf32> to vector<1x2x32xf32>
    tpu.vector_store %arg9[%64, %c0_15, %c0_16], %67 {strides = array<i32>} : memref<8x2x32xf32, #tpu.memory_space<vmem>>, vector<1x2x32xf32>,
    %c1_i32 = arith.constant 1 : i32
    %68 = arith.index_cast %c1_i32 : i32 to index
    %c0_17 = arith.constant 0 : index
    %c0_18 = arith.constant 0 : index
    %69 = vector.load %arg1[%68, %c0_17, %c0_18] : memref<8x2x128xf32, #tpu.memory_space<vmem>>, vector<1x2x128xf32>
    %70 = vector.shape_cast %69 : vector<1x2x128xf32> to vector<2x128xf32>
    %cst_19 = arith.constant dense<0.000000e+00> : vector<2x128xf32>
    %71 = tpu.matmul %35, %0, %cst_19 {dimension_numbers = #tpu.dot_dimension_numbers<[1], [0], [0], [1], [0, 0, 1, 1], [], []>} : vector<2x32xf32>, vector<32x128xf32>, vector<2x128xf32> -> vector<2x128xf32>
    %72 = arith.addf %70, %71 : vector<2x128xf32>
    %73 = vector.extract_strided_slice %72 {offsets = [0, 0], sizes = [2, 32], strides = [1, 1]} : vector<2x128xf32> to vector<2x32xf32>
    %74 = arith.negf %73 : vector<2x32xf32>
    %75 = math.exp %74 : vector<2x32xf32>
    %cst_20 = arith.constant 1.000000e+00 : f32
    %76 = vector.broadcast %cst_20 : f32 to vector<2x32xf32>
    %77 = arith.addf %76, %75 : vector<2x32xf32>
    %78 = arith.divf %76, %77 : vector<2x32xf32>
    %79 = vector.extract_strided_slice %72 {offsets = [0, 32], sizes = [2, 32], strides = [1, 1]} : vector<2x128xf32> to vector<2x32xf32>
    %80 = arith.negf %79 : vector<2x32xf32>
    %81 = math.exp %80 : vector<2x32xf32>
    %cst_21 = arith.constant 1.000000e+00 : f32
    %82 = vector.broadcast %cst_21 : f32 to vector<2x32xf32>
    %83 = arith.addf %82, %81 : vector<2x32xf32>
    %84 = arith.divf %82, %83 : vector<2x32xf32>
    %85 = vector.extract_strided_slice %72 {offsets = [0, 64], sizes = [2, 32], strides = [1, 1]} : vector<2x128xf32> to vector<2x32xf32>
    %86 = math.tanh %85 : vector<2x32xf32>
    %87 = vector.extract_strided_slice %72 {offsets = [0, 96], sizes = [2, 32], strides = [1, 1]} : vector<2x128xf32> to vector<2x32xf32>
    %88 = arith.negf %87 : vector<2x32xf32>
    %89 = math.exp %88 : vector<2x32xf32>
    %cst_22 = arith.constant 1.000000e+00 : f32
    %90 = vector.broadcast %cst_22 : f32 to vector<2x32xf32>
    %91 = arith.addf %90, %89 : vector<2x32xf32>
    %92 = arith.divf %90, %91 : vector<2x32xf32>
    %93 = arith.mulf %84, %33 : vector<2x32xf32>
    %94 = arith.mulf %78, %86 : vector<2x32xf32>
    %95 = arith.addf %93, %94 : vector<2x32xf32>
    %96 = math.tanh %95 : vector<2x32xf32>
    %97 = arith.mulf %92, %96 : vector<2x32xf32>
    %98 = tpu.concatenate %97, %63 in 1 : vector<2x32xf32>, vector<2x32xf32> -> vector<2x64xf32>
    %cst_23 = arith.constant dense<0.000000e+00> : vector<2x128xf32>
    %99 = tpu.matmul %98, %1, %cst_23 {dimension_numbers = #tpu.dot_dimension_numbers<[1], [0], [0], [1], [0, 0, 1, 1], [], []>} : vector<2x64xf32>, vector<64x128xf32>, vector<2x128xf32> -> vector<2x128xf32>
    %100 = arith.addf %99, %4 : vector<2x128xf32>
    %101 = vector.extract_strided_slice %100 {offsets = [0, 0], sizes = [2, 32], strides = [1, 1]} : vector<2x128xf32> to vector<2x32xf32>
    %102 = arith.negf %101 : vector<2x32xf32>
    %103 = math.exp %102 : vector<2x32xf32>
    %cst_24 = arith.constant 1.000000e+00 : f32
    %104 = vector.broadcast %cst_24 : f32 to vector<2x32xf32>
    %105 = arith.addf %104, %103 : vector<2x32xf32>
    %106 = arith.divf %104, %105 : vector<2x32xf32>
    %107 = vector.extract_strided_slice %100 {offsets = [0, 32], sizes = [2, 32], strides = [1, 1]} : vector<2x128xf32> to vector<2x32xf32>
    %108 = arith.negf %107 : vector<2x32xf32>
    %109 = math.exp %108 : vector<2x32xf32>
    %cst_25 = arith.constant 1.000000e+00 : f32
    %110 = vector.broadcast %cst_25 : f32 to vector<2x32xf32>
    %111 = arith.addf %110, %109 : vector<2x32xf32>
    %112 = arith.divf %110, %111 : vector<2x32xf32>
    %113 = vector.extract_strided_slice %100 {offsets = [0, 64], sizes = [2, 32], strides = [1, 1]} : vector<2x128xf32> to vector<2x32xf32>
    %114 = math.tanh %113 : vector<2x32xf32>
    %115 = vector.extract_strided_slice %100 {offsets = [0, 96], sizes = [2, 32], strides = [1, 1]} : vector<2x128xf32> to vector<2x32xf32>
    %116 = arith.negf %115 : vector<2x32xf32>
    %117 = math.exp %116 : vector<2x32xf32>
    %cst_26 = arith.constant 1.000000e+00 : f32
    %118 = vector.broadcast %cst_26 : f32 to vector<2x32xf32>
    %119 = arith.addf %118, %117 : vector<2x32xf32>
    %120 = arith.divf %118, %119 : vector<2x32xf32>
    %121 = arith.mulf %112, %61 : vector<2x32xf32>
    %122 = arith.mulf %106, %114 : vector<2x32xf32>
    %123 = arith.addf %121, %122 : vector<2x32xf32>
    %124 = math.tanh %123 : vector<2x32xf32>
    %125 = arith.mulf %120, %124 : vector<2x32xf32>
    %126 = arith.index_cast %c1_i32 : i32 to index
    %c0_27 = arith.constant 0 : index
    %c0_28 = arith.constant 0 : index
    %127 = vector.load %arg9[%126, %c0_27, %c0_28] : memref<8x2x32xf32, #tpu.memory_space<vmem>>, vector<1x2x32xf32>
    %128 = vector.shape_cast %127 : vector<1x2x32xf32> to vector<2x32xf32>
    %129 = vector.shape_cast %125 : vector<2x32xf32> to vector<1x2x32xf32>
    tpu.vector_store %arg9[%126, %c0_27, %c0_28], %129 {strides = array<i32>} : memref<8x2x32xf32, #tpu.memory_space<vmem>>, vector<1x2x32xf32>,
    %c2_i32 = arith.constant 2 : i32
    %130 = arith.index_cast %c2_i32 : i32 to index
    %c0_29 = arith.constant 0 : index
    %c0_30 = arith.constant 0 : index
    %131 = vector.load %arg1[%130, %c0_29, %c0_30] : memref<8x2x128xf32, #tpu.memory_space<vmem>>, vector<1x2x128xf32>
    %132 = vector.shape_cast %131 : vector<1x2x128xf32> to vector<2x128xf32>
    %cst_31 = arith.constant dense<0.000000e+00> : vector<2x128xf32>
    %133 = tpu.matmul %97, %0, %cst_31 {dimension_numbers = #tpu.dot_dimension_numbers<[1], [0], [0], [1], [0, 0, 1, 1], [], []>} : vector<2x32xf32>, vector<32x128xf32>, vector<2x128xf32> -> vector<2x128xf32>
    %134 = arith.addf %132, %133 : vector<2x128xf32>
    %135 = vector.extract_strided_slice %134 {offsets = [0, 0], sizes = [2, 32], strides = [1, 1]} : vector<2x128xf32> to vector<2x32xf32>
    %136 = arith.negf %135 : vector<2x32xf32>
    %137 = math.exp %136 : vector<2x32xf32>
    %cst_32 = arith.constant 1.000000e+00 : f32
    %138 = vector.broadcast %cst_32 : f32 to vector<2x32xf32>
    %139 = arith.addf %138, %137 : vector<2x32xf32>
    %140 = arith.divf %138, %139 : vector<2x32xf32>
    %141 = vector.extract_strided_slice %134 {offsets = [0, 32], sizes = [2, 32], strides = [1, 1]} : vector<2x128xf32> to vector<2x32xf32>
    %142 = arith.negf %141 : vector<2x32xf32>
    %143 = math.exp %142 : vector<2x32xf32>
    %cst_33 = arith.constant 1.000000e+00 : f32
    %144 = vector.broadcast %cst_33 : f32 to vector<2x32xf32>
    %145 = arith.addf %144, %143 : vector<2x32xf32>
    %146 = arith.divf %144, %145 : vector<2x32xf32>
    %147 = vector.extract_strided_slice %134 {offsets = [0, 64], sizes = [2, 32], strides = [1, 1]} : vector<2x128xf32> to vector<2x32xf32>
    %148 = math.tanh %147 : vector<2x32xf32>
    %149 = vector.extract_strided_slice %134 {offsets = [0, 96], sizes = [2, 32], strides = [1, 1]} : vector<2x128xf32> to vector<2x32xf32>
    %150 = arith.negf %149 : vector<2x32xf32>
    %151 = math.exp %150 : vector<2x32xf32>
    %cst_34 = arith.constant 1.000000e+00 : f32
    %152 = vector.broadcast %cst_34 : f32 to vector<2x32xf32>
    %153 = arith.addf %152, %151 : vector<2x32xf32>
    %154 = arith.divf %152, %153 : vector<2x32xf32>
    %155 = arith.mulf %146, %95 : vector<2x32xf32>
    %156 = arith.mulf %140, %148 : vector<2x32xf32>
    %157 = arith.addf %155, %156 : vector<2x32xf32>
    %158 = math.tanh %157 : vector<2x32xf32>
    %159 = arith.mulf %154, %158 : vector<2x32xf32>
    %160 = tpu.concatenate %159, %125 in 1 : vector<2x32xf32>, vector<2x32xf32> -> vector<2x64xf32>
    %cst_35 = arith.constant dense<0.000000e+00> : vector<2x128xf32>
    %161 = tpu.matmul %160, %1, %cst_35 {dimension_numbers = #tpu.dot_dimension_numbers<[1], [0], [0], [1], [0, 0, 1, 1], [], []>} : vector<2x64xf32>, vector<64x128xf32>, vector<2x128xf32> -> vector<2x128xf32>
    %162 = arith.addf %161, %4 : vector<2x128xf32>
    %163 = vector.extract_strided_slice %162 {offsets = [0, 0], sizes = [2, 32], strides = [1, 1]} : vector<2x128xf32> to vector<2x32xf32>
    %164 = arith.negf %163 : vector<2x32xf32>
    %165 = math.exp %164 : vector<2x32xf32>
    %cst_36 = arith.constant 1.000000e+00 : f32
    %166 = vector.broadcast %cst_36 : f32 to vector<2x32xf32>
    %167 = arith.addf %166, %165 : vector<2x32xf32>
    %168 = arith.divf %166, %167 : vector<2x32xf32>
    %169 = vector.extract_strided_slice %162 {offsets = [0, 32], sizes = [2, 32], strides = [1, 1]} : vector<2x128xf32> to vector<2x32xf32>
    %170 = arith.negf %169 : vector<2x32xf32>
    %171 = math.exp %170 : vector<2x32xf32>
    %cst_37 = arith.constant 1.000000e+00 : f32
    %172 = vector.broadcast %cst_37 : f32 to vector<2x32xf32>
    %173 = arith.addf %172, %171 : vector<2x32xf32>
    %174 = arith.divf %172, %173 : vector<2x32xf32>
    %175 = vector.extract_strided_slice %162 {offsets = [0, 64], sizes = [2, 32], strides = [1, 1]} : vector<2x128xf32> to vector<2x32xf32>
    %176 = math.tanh %175 : vector<2x32xf32>
    %177 = vector.extract_strided_slice %162 {offsets = [0, 96], sizes = [2, 32], strides = [1, 1]} : vector<2x128xf32> to vector<2x32xf32>
    %178 = arith.negf %177 : vector<2x32xf32>
    %179 = math.exp %178 : vector<2x32xf32>
    %cst_38 = arith.constant 1.000000e+00 : f32
    %180 = vector.broadcast %cst_38 : f32 to vector<2x32xf32>
    %181 = arith.addf %180, %179 : vector<2x32xf32>
    %182 = arith.divf %180, %181 : vector<2x32xf32>
    %183 = arith.mulf %174, %123 : vector<2x32xf32>
    %184 = arith.mulf %168, %176 : vector<2x32xf32>
    %185 = arith.addf %183, %184 : vector<2x32xf32>
    %186 = math.tanh %185 : vector<2x32xf32>
    %187 = arith.mulf %182, %186 : vector<2x32xf32>
    %188 = arith.index_cast %c2_i32 : i32 to index
    %c0_39 = arith.constant 0 : index
    %c0_40 = arith.constant 0 : index
    %189 = vector.load %arg9[%188, %c0_39, %c0_40] : memref<8x2x32xf32, #tpu.memory_space<vmem>>, vector<1x2x32xf32>
    %190 = vector.shape_cast %189 : vector<1x2x32xf32> to vector<2x32xf32>
    %191 = vector.shape_cast %187 : vector<2x32xf32> to vector<1x2x32xf32>
    tpu.vector_store %arg9[%188, %c0_39, %c0_40], %191 {strides = array<i32>} : memref<8x2x32xf32, #tpu.memory_space<vmem>>, vector<1x2x32xf32>,
    %c3_i32 = arith.constant 3 : i32
    %192 = arith.index_cast %c3_i32 : i32 to index
    %c0_41 = arith.constant 0 : index
    %c0_42 = arith.constant 0 : index
    %193 = vector.load %arg1[%192, %c0_41, %c0_42] : memref<8x2x128xf32, #tpu.memory_space<vmem>>, vector<1x2x128xf32>
    %194 = vector.shape_cast %193 : vector<1x2x128xf32> to vector<2x128xf32>
    %cst_43 = arith.constant dense<0.000000e+00> : vector<2x128xf32>
    %195 = tpu.matmul %159, %0, %cst_43 {dimension_numbers = #tpu.dot_dimension_numbers<[1], [0], [0], [1], [0, 0, 1, 1], [], []>} : vector<2x32xf32>, vector<32x128xf32>, vector<2x128xf32> -> vector<2x128xf32>
    %196 = arith.addf %194, %195 : vector<2x128xf32>
    %197 = vector.extract_strided_slice %196 {offsets = [0, 0], sizes = [2, 32], strides = [1, 1]} : vector<2x128xf32> to vector<2x32xf32>
    %198 = arith.negf %197 : vector<2x32xf32>
    %199 = math.exp %198 : vector<2x32xf32>
    %cst_44 = arith.constant 1.000000e+00 : f32
    %200 = vector.broadcast %cst_44 : f32 to vector<2x32xf32>
    %201 = arith.addf %200, %199 : vector<2x32xf32>
    %202 = arith.divf %200, %201 : vector<2x32xf32>
    %203 = vector.extract_strided_slice %196 {offsets = [0, 32], sizes = [2, 32], strides = [1, 1]} : vector<2x128xf32> to vector<2x32xf32>
    %204 = arith.negf %203 : vector<2x32xf32>
    %205 = math.exp %204 : vector<2x32xf32>
    %cst_45 = arith.constant 1.000000e+00 : f32
    %206 = vector.broadcast %cst_45 : f32 to vector<2x32xf32>
    %207 = arith.addf %206, %205 : vector<2x32xf32>
    %208 = arith.divf %206, %207 : vector<2x32xf32>
    %209 = vector.extract_strided_slice %196 {offsets = [0, 64], sizes = [2, 32], strides = [1, 1]} : vector<2x128xf32> to vector<2x32xf32>
    %210 = math.tanh %209 : vector<2x32xf32>
    %211 = vector.extract_strided_slice %196 {offsets = [0, 96], sizes = [2, 32], strides = [1, 1]} : vector<2x128xf32> to vector<2x32xf32>
    %212 = arith.negf %211 : vector<2x32xf32>
    %213 = math.exp %212 : vector<2x32xf32>
    %cst_46 = arith.constant 1.000000e+00 : f32
    %214 = vector.broadcast %cst_46 : f32 to vector<2x32xf32>
    %215 = arith.addf %214, %213 : vector<2x32xf32>
    %216 = arith.divf %214, %215 : vector<2x32xf32>
    %217 = arith.mulf %208, %157 : vector<2x32xf32>
    %218 = arith.mulf %202, %210 : vector<2x32xf32>
    %219 = arith.addf %217, %218 : vector<2x32xf32>
    %220 = math.tanh %219 : vector<2x32xf32>
    %221 = arith.mulf %216, %220 : vector<2x32xf32>
    %222 = tpu.concatenate %221, %187 in 1 : vector<2x32xf32>, vector<2x32xf32> -> vector<2x64xf32>
    %cst_47 = arith.constant dense<0.000000e+00> : vector<2x128xf32>
    %223 = tpu.matmul %222, %1, %cst_47 {dimension_numbers = #tpu.dot_dimension_numbers<[1], [0], [0], [1], [0, 0, 1, 1], [], []>} : vector<2x64xf32>, vector<64x128xf32>, vector<2x128xf32> -> vector<2x128xf32>
    %224 = arith.addf %223, %4 : vector<2x128xf32>
    %225 = vector.extract_strided_slice %224 {offsets = [0, 0], sizes = [2, 32], strides = [1, 1]} : vector<2x128xf32> to vector<2x32xf32>
    %226 = arith.negf %225 : vector<2x32xf32>
    %227 = math.exp %226 : vector<2x32xf32>
    %cst_48 = arith.constant 1.000000e+00 : f32
    %228 = vector.broadcast %cst_48 : f32 to vector<2x32xf32>
    %229 = arith.addf %228, %227 : vector<2x32xf32>
    %230 = arith.divf %228, %229 : vector<2x32xf32>
    %231 = vector.extract_strided_slice %224 {offsets = [0, 32], sizes = [2, 32], strides = [1, 1]} : vector<2x128xf32> to vector<2x32xf32>
    %232 = arith.negf %231 : vector<2x32xf32>
    %233 = math.exp %232 : vector<2x32xf32>
    %cst_49 = arith.constant 1.000000e+00 : f32
    %234 = vector.broadcast %cst_49 : f32 to vector<2x32xf32>
    %235 = arith.addf %234, %233 : vector<2x32xf32>
    %236 = arith.divf %234, %235 : vector<2x32xf32>
    %237 = vector.extract_strided_slice %224 {offsets = [0, 64], sizes = [2, 32], strides = [1, 1]} : vector<2x128xf32> to vector<2x32xf32>
    %238 = math.tanh %237 : vector<2x32xf32>
    %239 = vector.extract_strided_slice %224 {offsets = [0, 96], sizes = [2, 32], strides = [1, 1]} : vector<2x128xf32> to vector<2x32xf32>
    %240 = arith.negf %239 : vector<2x32xf32>
    %241 = math.exp %240 : vector<2x32xf32>
    %cst_50 = arith.constant 1.000000e+00 : f32
    %242 = vector.broadcast %cst_50 : f32 to vector<2x32xf32>
    %243 = arith.addf %242, %241 : vector<2x32xf32>
    %244 = arith.divf %242, %243 : vector<2x32xf32>
    %245 = arith.mulf %236, %185 : vector<2x32xf32>
    %246 = arith.mulf %230, %238 : vector<2x32xf32>
    %247 = arith.addf %245, %246 : vector<2x32xf32>
    %248 = math.tanh %247 : vector<2x32xf32>
    %249 = arith.mulf %244, %248 : vector<2x32xf32>
    %250 = arith.index_cast %c3_i32 : i32 to index
    %c0_51 = arith.constant 0 : index
    %c0_52 = arith.constant 0 : index
    %251 = vector.load %arg9[%250, %c0_51, %c0_52] : memref<8x2x32xf32, #tpu.memory_space<vmem>>, vector<1x2x32xf32>
    %252 = vector.shape_cast %251 : vector<1x2x32xf32> to vector<2x32xf32>
    %253 = vector.shape_cast %249 : vector<2x32xf32> to vector<1x2x32xf32>
    tpu.vector_store %arg9[%250, %c0_51, %c0_52], %253 {strides = array<i32>} : memref<8x2x32xf32, #tpu.memory_space<vmem>>, vector<1x2x32xf32>,
    %c4_i32 = arith.constant 4 : i32
    %254 = arith.index_cast %c4_i32 : i32 to index
    %c0_53 = arith.constant 0 : index
    %c0_54 = arith.constant 0 : index
    %255 = vector.load %arg1[%254, %c0_53, %c0_54] : memref<8x2x128xf32, #tpu.memory_space<vmem>>, vector<1x2x128xf32>
    %256 = vector.shape_cast %255 : vector<1x2x128xf32> to vector<2x128xf32>
    %cst_55 = arith.constant dense<0.000000e+00> : vector<2x128xf32>
    %257 = tpu.matmul %221, %0, %cst_55 {dimension_numbers = #tpu.dot_dimension_numbers<[1], [0], [0], [1], [0, 0, 1, 1], [], []>} : vector<2x32xf32>, vector<32x128xf32>, vector<2x128xf32> -> vector<2x128xf32>
    %258 = arith.addf %256, %257 : vector<2x128xf32>
    %259 = vector.extract_strided_slice %258 {offsets = [0, 0], sizes = [2, 32], strides = [1, 1]} : vector<2x128xf32> to vector<2x32xf32>
    %260 = arith.negf %259 : vector<2x32xf32>
    %261 = math.exp %260 : vector<2x32xf32>
    %cst_56 = arith.constant 1.000000e+00 : f32
    %262 = vector.broadcast %cst_56 : f32 to vector<2x32xf32>
    %263 = arith.addf %262, %261 : vector<2x32xf32>
    %264 = arith.divf %262, %263 : vector<2x32xf32>
    %265 = vector.extract_strided_slice %258 {offsets = [0, 32], sizes = [2, 32], strides = [1, 1]} : vector<2x128xf32> to vector<2x32xf32>
    %266 = arith.negf %265 : vector<2x32xf32>
    %267 = math.exp %266 : vector<2x32xf32>
    %cst_57 = arith.constant 1.000000e+00 : f32
    %268 = vector.broadcast %cst_57 : f32 to vector<2x32xf32>
    %269 = arith.addf %268, %267 : vector<2x32xf32>
    %270 = arith.divf %268, %269 : vector<2x32xf32>
    %271 = vector.extract_strided_slice %258 {offsets = [0, 64], sizes = [2, 32], strides = [1, 1]} : vector<2x128xf32> to vector<2x32xf32>
    %272 = math.tanh %271 : vector<2x32xf32>
    %273 = vector.extract_strided_slice %258 {offsets = [0, 96], sizes = [2, 32], strides = [1, 1]} : vector<2x128xf32> to vector<2x32xf32>
    %274 = arith.negf %273 : vector<2x32xf32>
    %275 = math.exp %274 : vector<2x32xf32>
    %cst_58 = arith.constant 1.000000e+00 : f32
    %276 = vector.broadcast %cst_58 : f32 to vector<2x32xf32>
    %277 = arith.addf %276, %275 : vector<2x32xf32>
    %278 = arith.divf %276, %277 : vector<2x32xf32>
    %279 = arith.mulf %270, %219 : vector<2x32xf32>
    %280 = arith.mulf %264, %272 : vector<2x32xf32>
    %281 = arith.addf %279, %280 : vector<2x32xf32>
    %282 = math.tanh %281 : vector<2x32xf32>
    %283 = arith.mulf %278, %282 : vector<2x32xf32>
    %284 = tpu.concatenate %283, %249 in 1 : vector<2x32xf32>, vector<2x32xf32> -> vector<2x64xf32>
    %cst_59 = arith.constant dense<0.000000e+00> : vector<2x128xf32>
    %285 = tpu.matmul %284, %1, %cst_59 {dimension_numbers = #tpu.dot_dimension_numbers<[1], [0], [0], [1], [0, 0, 1, 1], [], []>} : vector<2x64xf32>, vector<64x128xf32>, vector<2x128xf32> -> vector<2x128xf32>
    %286 = arith.addf %285, %4 : vector<2x128xf32>
    %287 = vector.extract_strided_slice %286 {offsets = [0, 0], sizes = [2, 32], strides = [1, 1]} : vector<2x128xf32> to vector<2x32xf32>
    %288 = arith.negf %287 : vector<2x32xf32>
    %289 = math.exp %288 : vector<2x32xf32>
    %cst_60 = arith.constant 1.000000e+00 : f32
    %290 = vector.broadcast %cst_60 : f32 to vector<2x32xf32>
    %291 = arith.addf %290, %289 : vector<2x32xf32>
    %292 = arith.divf %290, %291 : vector<2x32xf32>
    %293 = vector.extract_strided_slice %286 {offsets = [0, 32], sizes = [2, 32], strides = [1, 1]} : vector<2x128xf32> to vector<2x32xf32>
    %294 = arith.negf %293 : vector<2x32xf32>
    %295 = math.exp %294 : vector<2x32xf32>
    %cst_61 = arith.constant 1.000000e+00 : f32
    %296 = vector.broadcast %cst_61 : f32 to vector<2x32xf32>
    %297 = arith.addf %296, %295 : vector<2x32xf32>
    %298 = arith.divf %296, %297 : vector<2x32xf32>
    %299 = vector.extract_strided_slice %286 {offsets = [0, 64], sizes = [2, 32], strides = [1, 1]} : vector<2x128xf32> to vector<2x32xf32>
    %300 = math.tanh %299 : vector<2x32xf32>
    %301 = vector.extract_strided_slice %286 {offsets = [0, 96], sizes = [2, 32], strides = [1, 1]} : vector<2x128xf32> to vector<2x32xf32>
    %302 = arith.negf %301 : vector<2x32xf32>
    %303 = math.exp %302 : vector<2x32xf32>
    %cst_62 = arith.constant 1.000000e+00 : f32
    %304 = vector.broadcast %cst_62 : f32 to vector<2x32xf32>
    %305 = arith.addf %304, %303 : vector<2x32xf32>
    %306 = arith.divf %304, %305 : vector<2x32xf32>
    %307 = arith.mulf %298, %247 : vector<2x32xf32>
    %308 = arith.mulf %292, %300 : vector<2x32xf32>
    %309 = arith.addf %307, %308 : vector<2x32xf32>
    %310 = math.tanh %309 : vector<2x32xf32>
    %311 = arith.mulf %306, %310 : vector<2x32xf32>
    %312 = arith.index_cast %c4_i32 : i32 to index
    %c0_63 = arith.constant 0 : index
    %c0_64 = arith.constant 0 : index
    %313 = vector.load %arg9[%312, %c0_63, %c0_64] : memref<8x2x32xf32, #tpu.memory_space<vmem>>, vector<1x2x32xf32>
    %314 = vector.shape_cast %313 : vector<1x2x32xf32> to vector<2x32xf32>
    %315 = vector.shape_cast %311 : vector<2x32xf32> to vector<1x2x32xf32>
    tpu.vector_store %arg9[%312, %c0_63, %c0_64], %315 {strides = array<i32>} : memref<8x2x32xf32, #tpu.memory_space<vmem>>, vector<1x2x32xf32>,
    %c5_i32 = arith.constant 5 : i32
    %316 = arith.index_cast %c5_i32 : i32 to index
    %c0_65 = arith.constant 0 : index
    %c0_66 = arith.constant 0 : index
    %317 = vector.load %arg1[%316, %c0_65, %c0_66] : memref<8x2x128xf32, #tpu.memory_space<vmem>>, vector<1x2x128xf32>
    %318 = vector.shape_cast %317 : vector<1x2x128xf32> to vector<2x128xf32>
    %cst_67 = arith.constant dense<0.000000e+00> : vector<2x128xf32>
    %319 = tpu.matmul %283, %0, %cst_67 {dimension_numbers = #tpu.dot_dimension_numbers<[1], [0], [0], [1], [0, 0, 1, 1], [], []>} : vector<2x32xf32>, vector<32x128xf32>, vector<2x128xf32> -> vector<2x128xf32>
    %320 = arith.addf %318, %319 : vector<2x128xf32>
    %321 = vector.extract_strided_slice %320 {offsets = [0, 0], sizes = [2, 32], strides = [1, 1]} : vector<2x128xf32> to vector<2x32xf32>
    %322 = arith.negf %321 : vector<2x32xf32>
    %323 = math.exp %322 : vector<2x32xf32>
    %cst_68 = arith.constant 1.000000e+00 : f32
    %324 = vector.broadcast %cst_68 : f32 to vector<2x32xf32>
    %325 = arith.addf %324, %323 : vector<2x32xf32>
    %326 = arith.divf %324, %325 : vector<2x32xf32>
    %327 = vector.extract_strided_slice %320 {offsets = [0, 32], sizes = [2, 32], strides = [1, 1]} : vector<2x128xf32> to vector<2x32xf32>
    %328 = arith.negf %327 : vector<2x32xf32>
    %329 = math.exp %328 : vector<2x32xf32>
    %cst_69 = arith.constant 1.000000e+00 : f32
    %330 = vector.broadcast %cst_69 : f32 to vector<2x32xf32>
    %331 = arith.addf %330, %329 : vector<2x32xf32>
    %332 = arith.divf %330, %331 : vector<2x32xf32>
    %333 = vector.extract_strided_slice %320 {offsets = [0, 64], sizes = [2, 32], strides = [1, 1]} : vector<2x128xf32> to vector<2x32xf32>
    %334 = math.tanh %333 : vector<2x32xf32>
    %335 = vector.extract_strided_slice %320 {offsets = [0, 96], sizes = [2, 32], strides = [1, 1]} : vector<2x128xf32> to vector<2x32xf32>
    %336 = arith.negf %335 : vector<2x32xf32>
    %337 = math.exp %336 : vector<2x32xf32>
    %cst_70 = arith.constant 1.000000e+00 : f32
    %338 = vector.broadcast %cst_70 : f32 to vector<2x32xf32>
    %339 = arith.addf %338, %337 : vector<2x32xf32>
    %340 = arith.divf %338, %339 : vector<2x32xf32>
    %341 = arith.mulf %332, %281 : vector<2x32xf32>
    %342 = arith.mulf %326, %334 : vector<2x32xf32>
    %343 = arith.addf %341, %342 : vector<2x32xf32>
    %344 = math.tanh %343 : vector<2x32xf32>
    %345 = arith.mulf %340, %344 : vector<2x32xf32>
    %346 = tpu.concatenate %345, %311 in 1 : vector<2x32xf32>, vector<2x32xf32> -> vector<2x64xf32>
    %cst_71 = arith.constant dense<0.000000e+00> : vector<2x128xf32>
    %347 = tpu.matmul %346, %1, %cst_71 {dimension_numbers = #tpu.dot_dimension_numbers<[1], [0], [0], [1], [0, 0, 1, 1], [], []>} : vector<2x64xf32>, vector<64x128xf32>, vector<2x128xf32> -> vector<2x128xf32>
    %348 = arith.addf %347, %4 : vector<2x128xf32>
    %349 = vector.extract_strided_slice %348 {offsets = [0, 0], sizes = [2, 32], strides = [1, 1]} : vector<2x128xf32> to vector<2x32xf32>
    %350 = arith.negf %349 : vector<2x32xf32>
    %351 = math.exp %350 : vector<2x32xf32>
    %cst_72 = arith.constant 1.000000e+00 : f32
    %352 = vector.broadcast %cst_72 : f32 to vector<2x32xf32>
    %353 = arith.addf %352, %351 : vector<2x32xf32>
    %354 = arith.divf %352, %353 : vector<2x32xf32>
    %355 = vector.extract_strided_slice %348 {offsets = [0, 32], sizes = [2, 32], strides = [1, 1]} : vector<2x128xf32> to vector<2x32xf32>
    %356 = arith.negf %355 : vector<2x32xf32>
    %357 = math.exp %356 : vector<2x32xf32>
    %cst_73 = arith.constant 1.000000e+00 : f32
    %358 = vector.broadcast %cst_73 : f32 to vector<2x32xf32>
    %359 = arith.addf %358, %357 : vector<2x32xf32>
    %360 = arith.divf %358, %359 : vector<2x32xf32>
    %361 = vector.extract_strided_slice %348 {offsets = [0, 64], sizes = [2, 32], strides = [1, 1]} : vector<2x128xf32> to vector<2x32xf32>
    %362 = math.tanh %361 : vector<2x32xf32>
    %363 = vector.extract_strided_slice %348 {offsets = [0, 96], sizes = [2, 32], strides = [1, 1]} : vector<2x128xf32> to vector<2x32xf32>
    %364 = arith.negf %363 : vector<2x32xf32>
    %365 = math.exp %364 : vector<2x32xf32>
    %cst_74 = arith.constant 1.000000e+00 : f32
    %366 = vector.broadcast %cst_74 : f32 to vector<2x32xf32>
    %367 = arith.addf %366, %365 : vector<2x32xf32>
    %368 = arith.divf %366, %367 : vector<2x32xf32>
    %369 = arith.mulf %360, %309 : vector<2x32xf32>
    %370 = arith.mulf %354, %362 : vector<2x32xf32>
    %371 = arith.addf %369, %370 : vector<2x32xf32>
    %372 = math.tanh %371 : vector<2x32xf32>
    %373 = arith.mulf %368, %372 : vector<2x32xf32>
    %374 = arith.index_cast %c5_i32 : i32 to index
    %c0_75 = arith.constant 0 : index
    %c0_76 = arith.constant 0 : index
    %375 = vector.load %arg9[%374, %c0_75, %c0_76] : memref<8x2x32xf32, #tpu.memory_space<vmem>>, vector<1x2x32xf32>
    %376 = vector.shape_cast %375 : vector<1x2x32xf32> to vector<2x32xf32>
    %377 = vector.shape_cast %373 : vector<2x32xf32> to vector<1x2x32xf32>
    tpu.vector_store %arg9[%374, %c0_75, %c0_76], %377 {strides = array<i32>} : memref<8x2x32xf32, #tpu.memory_space<vmem>>, vector<1x2x32xf32>,
    %c6_i32 = arith.constant 6 : i32
    %378 = arith.index_cast %c6_i32 : i32 to index
    %c0_77 = arith.constant 0 : index
    %c0_78 = arith.constant 0 : index
    %379 = vector.load %arg1[%378, %c0_77, %c0_78] : memref<8x2x128xf32, #tpu.memory_space<vmem>>, vector<1x2x128xf32>
    %380 = vector.shape_cast %379 : vector<1x2x128xf32> to vector<2x128xf32>
    %cst_79 = arith.constant dense<0.000000e+00> : vector<2x128xf32>
    %381 = tpu.matmul %345, %0, %cst_79 {dimension_numbers = #tpu.dot_dimension_numbers<[1], [0], [0], [1], [0, 0, 1, 1], [], []>} : vector<2x32xf32>, vector<32x128xf32>, vector<2x128xf32> -> vector<2x128xf32>
    %382 = arith.addf %380, %381 : vector<2x128xf32>
    %383 = vector.extract_strided_slice %382 {offsets = [0, 0], sizes = [2, 32], strides = [1, 1]} : vector<2x128xf32> to vector<2x32xf32>
    %384 = arith.negf %383 : vector<2x32xf32>
    %385 = math.exp %384 : vector<2x32xf32>
    %cst_80 = arith.constant 1.000000e+00 : f32
    %386 = vector.broadcast %cst_80 : f32 to vector<2x32xf32>
    %387 = arith.addf %386, %385 : vector<2x32xf32>
    %388 = arith.divf %386, %387 : vector<2x32xf32>
    %389 = vector.extract_strided_slice %382 {offsets = [0, 32], sizes = [2, 32], strides = [1, 1]} : vector<2x128xf32> to vector<2x32xf32>
    %390 = arith.negf %389 : vector<2x32xf32>
    %391 = math.exp %390 : vector<2x32xf32>
    %cst_81 = arith.constant 1.000000e+00 : f32
    %392 = vector.broadcast %cst_81 : f32 to vector<2x32xf32>
    %393 = arith.addf %392, %391 : vector<2x32xf32>
    %394 = arith.divf %392, %393 : vector<2x32xf32>
    %395 = vector.extract_strided_slice %382 {offsets = [0, 64], sizes = [2, 32], strides = [1, 1]} : vector<2x128xf32> to vector<2x32xf32>
    %396 = math.tanh %395 : vector<2x32xf32>
    %397 = vector.extract_strided_slice %382 {offsets = [0, 96], sizes = [2, 32], strides = [1, 1]} : vector<2x128xf32> to vector<2x32xf32>
    %398 = arith.negf %397 : vector<2x32xf32>
    %399 = math.exp %398 : vector<2x32xf32>
    %cst_82 = arith.constant 1.000000e+00 : f32
    %400 = vector.broadcast %cst_82 : f32 to vector<2x32xf32>
    %401 = arith.addf %400, %399 : vector<2x32xf32>
    %402 = arith.divf %400, %401 : vector<2x32xf32>
    %403 = arith.mulf %394, %343 : vector<2x32xf32>
    %404 = arith.mulf %388, %396 : vector<2x32xf32>
    %405 = arith.addf %403, %404 : vector<2x32xf32>
    %406 = math.tanh %405 : vector<2x32xf32>
    %407 = arith.mulf %402, %406 : vector<2x32xf32>
    %408 = tpu.concatenate %407, %373 in 1 : vector<2x32xf32>, vector<2x32xf32> -> vector<2x64xf32>
    %cst_83 = arith.constant dense<0.000000e+00> : vector<2x128xf32>
    %409 = tpu.matmul %408, %1, %cst_83 {dimension_numbers = #tpu.dot_dimension_numbers<[1], [0], [0], [1], [0, 0, 1, 1], [], []>} : vector<2x64xf32>, vector<64x128xf32>, vector<2x128xf32> -> vector<2x128xf32>
    %410 = arith.addf %409, %4 : vector<2x128xf32>
    %411 = vector.extract_strided_slice %410 {offsets = [0, 0], sizes = [2, 32], strides = [1, 1]} : vector<2x128xf32> to vector<2x32xf32>
    %412 = arith.negf %411 : vector<2x32xf32>
    %413 = math.exp %412 : vector<2x32xf32>
    %cst_84 = arith.constant 1.000000e+00 : f32
    %414 = vector.broadcast %cst_84 : f32 to vector<2x32xf32>
    %415 = arith.addf %414, %413 : vector<2x32xf32>
    %416 = arith.divf %414, %415 : vector<2x32xf32>
    %417 = vector.extract_strided_slice %410 {offsets = [0, 32], sizes = [2, 32], strides = [1, 1]} : vector<2x128xf32> to vector<2x32xf32>
    %418 = arith.negf %417 : vector<2x32xf32>
    %419 = math.exp %418 : vector<2x32xf32>
    %cst_85 = arith.constant 1.000000e+00 : f32
    %420 = vector.broadcast %cst_85 : f32 to vector<2x32xf32>
    %421 = arith.addf %420, %419 : vector<2x32xf32>
    %422 = arith.divf %420, %421 : vector<2x32xf32>
    %423 = vector.extract_strided_slice %410 {offsets = [0, 64], sizes = [2, 32], strides = [1, 1]} : vector<2x128xf32> to vector<2x32xf32>
    %424 = math.tanh %423 : vector<2x32xf32>
    %425 = vector.extract_strided_slice %410 {offsets = [0, 96], sizes = [2, 32], strides = [1, 1]} : vector<2x128xf32> to vector<2x32xf32>
    %426 = arith.negf %425 : vector<2x32xf32>
    %427 = math.exp %426 : vector<2x32xf32>
    %cst_86 = arith.constant 1.000000e+00 : f32
    %428 = vector.broadcast %cst_86 : f32 to vector<2x32xf32>
    %429 = arith.addf %428, %427 : vector<2x32xf32>
    %430 = arith.divf %428, %429 : vector<2x32xf32>
    %431 = arith.mulf %422, %371 : vector<2x32xf32>
    %432 = arith.mulf %416, %424 : vector<2x32xf32>
    %433 = arith.addf %431, %432 : vector<2x32xf32>
    %434 = math.tanh %433 : vector<2x32xf32>
    %435 = arith.mulf %430, %434 : vector<2x32xf32>
    %436 = arith.index_cast %c6_i32 : i32 to index
    %c0_87 = arith.constant 0 : index
    %c0_88 = arith.constant 0 : index
    %437 = vector.load %arg9[%436, %c0_87, %c0_88] : memref<8x2x32xf32, #tpu.memory_space<vmem>>, vector<1x2x32xf32>
    %438 = vector.shape_cast %437 : vector<1x2x32xf32> to vector<2x32xf32>
    %439 = vector.shape_cast %435 : vector<2x32xf32> to vector<1x2x32xf32>
    tpu.vector_store %arg9[%436, %c0_87, %c0_88], %439 {strides = array<i32>} : memref<8x2x32xf32, #tpu.memory_space<vmem>>, vector<1x2x32xf32>,
    %c7_i32 = arith.constant 7 : i32
    %440 = arith.index_cast %c7_i32 : i32 to index
    %c0_89 = arith.constant 0 : index
    %c0_90 = arith.constant 0 : index
    %441 = vector.load %arg1[%440, %c0_89, %c0_90] : memref<8x2x128xf32, #tpu.memory_space<vmem>>, vector<1x2x128xf32>
    %442 = vector.shape_cast %441 : vector<1x2x128xf32> to vector<2x128xf32>
    %cst_91 = arith.constant dense<0.000000e+00> : vector<2x128xf32>
    %443 = tpu.matmul %407, %0, %cst_91 {dimension_numbers = #tpu.dot_dimension_numbers<[1], [0], [0], [1], [0, 0, 1, 1], [], []>} : vector<2x32xf32>, vector<32x128xf32>, vector<2x128xf32> -> vector<2x128xf32>
    %444 = arith.addf %442, %443 : vector<2x128xf32>
    %445 = vector.extract_strided_slice %444 {offsets = [0, 0], sizes = [2, 32], strides = [1, 1]} : vector<2x128xf32> to vector<2x32xf32>
    %446 = arith.negf %445 : vector<2x32xf32>
    %447 = math.exp %446 : vector<2x32xf32>
    %cst_92 = arith.constant 1.000000e+00 : f32
    %448 = vector.broadcast %cst_92 : f32 to vector<2x32xf32>
    %449 = arith.addf %448, %447 : vector<2x32xf32>
    %450 = arith.divf %448, %449 : vector<2x32xf32>
    %451 = vector.extract_strided_slice %444 {offsets = [0, 32], sizes = [2, 32], strides = [1, 1]} : vector<2x128xf32> to vector<2x32xf32>
    %452 = arith.negf %451 : vector<2x32xf32>
    %453 = math.exp %452 : vector<2x32xf32>
    %cst_93 = arith.constant 1.000000e+00 : f32
    %454 = vector.broadcast %cst_93 : f32 to vector<2x32xf32>
    %455 = arith.addf %454, %453 : vector<2x32xf32>
    %456 = arith.divf %454, %455 : vector<2x32xf32>
    %457 = vector.extract_strided_slice %444 {offsets = [0, 64], sizes = [2, 32], strides = [1, 1]} : vector<2x128xf32> to vector<2x32xf32>
    %458 = math.tanh %457 : vector<2x32xf32>
    %459 = vector.extract_strided_slice %444 {offsets = [0, 96], sizes = [2, 32], strides = [1, 1]} : vector<2x128xf32> to vector<2x32xf32>
    %460 = arith.negf %459 : vector<2x32xf32>
    %461 = math.exp %460 : vector<2x32xf32>
    %cst_94 = arith.constant 1.000000e+00 : f32
    %462 = vector.broadcast %cst_94 : f32 to vector<2x32xf32>
    %463 = arith.addf %462, %461 : vector<2x32xf32>
    %464 = arith.divf %462, %463 : vector<2x32xf32>
    %465 = arith.mulf %456, %405 : vector<2x32xf32>
    %466 = arith.mulf %450, %458 : vector<2x32xf32>
    %467 = arith.addf %465, %466 : vector<2x32xf32>
    %468 = math.tanh %467 : vector<2x32xf32>
    %469 = arith.mulf %464, %468 : vector<2x32xf32>
    %470 = tpu.concatenate %469, %435 in 1 : vector<2x32xf32>, vector<2x32xf32> -> vector<2x64xf32>
    %cst_95 = arith.constant dense<0.000000e+00> : vector<2x128xf32>
    %471 = tpu.matmul %470, %1, %cst_95 {dimension_numbers = #tpu.dot_dimension_numbers<[1], [0], [0], [1], [0, 0, 1, 1], [], []>} : vector<2x64xf32>, vector<64x128xf32>, vector<2x128xf32> -> vector<2x128xf32>
    %472 = arith.addf %471, %4 : vector<2x128xf32>
    %473 = vector.extract_strided_slice %472 {offsets = [0, 0], sizes = [2, 32], strides = [1, 1]} : vector<2x128xf32> to vector<2x32xf32>
    %474 = arith.negf %473 : vector<2x32xf32>
    %475 = math.exp %474 : vector<2x32xf32>
    %cst_96 = arith.constant 1.000000e+00 : f32
    %476 = vector.broadcast %cst_96 : f32 to vector<2x32xf32>
    %477 = arith.addf %476, %475 : vector<2x32xf32>
    %478 = arith.divf %476, %477 : vector<2x32xf32>
    %479 = vector.extract_strided_slice %472 {offsets = [0, 32], sizes = [2, 32], strides = [1, 1]} : vector<2x128xf32> to vector<2x32xf32>
    %480 = arith.negf %479 : vector<2x32xf32>
    %481 = math.exp %480 : vector<2x32xf32>
    %cst_97 = arith.constant 1.000000e+00 : f32
    %482 = vector.broadcast %cst_97 : f32 to vector<2x32xf32>
    %483 = arith.addf %482, %481 : vector<2x32xf32>
    %484 = arith.divf %482, %483 : vector<2x32xf32>
    %485 = vector.extract_strided_slice %472 {offsets = [0, 64], sizes = [2, 32], strides = [1, 1]} : vector<2x128xf32> to vector<2x32xf32>
    %486 = math.tanh %485 : vector<2x32xf32>
    %487 = vector.extract_strided_slice %472 {offsets = [0, 96], sizes = [2, 32], strides = [1, 1]} : vector<2x128xf32> to vector<2x32xf32>
    %488 = arith.negf %487 : vector<2x32xf32>
    %489 = math.exp %488 : vector<2x32xf32>
    %cst_98 = arith.constant 1.000000e+00 : f32
    %490 = vector.broadcast %cst_98 : f32 to vector<2x32xf32>
    %491 = arith.addf %490, %489 : vector<2x32xf32>
    %492 = arith.divf %490, %491 : vector<2x32xf32>
    %493 = arith.mulf %484, %433 : vector<2x32xf32>
    %494 = arith.mulf %478, %486 : vector<2x32xf32>
    %495 = arith.addf %493, %494 : vector<2x32xf32>
    %496 = math.tanh %495 : vector<2x32xf32>
    %497 = arith.mulf %492, %496 : vector<2x32xf32>
    %498 = arith.index_cast %c7_i32 : i32 to index
    %c0_99 = arith.constant 0 : index
    %c0_100 = arith.constant 0 : index
    %499 = vector.load %arg9[%498, %c0_99, %c0_100] : memref<8x2x32xf32, #tpu.memory_space<vmem>>, vector<1x2x32xf32>
    %500 = vector.shape_cast %499 : vector<1x2x32xf32> to vector<2x32xf32>
    %501 = vector.shape_cast %497 : vector<2x32xf32> to vector<1x2x32xf32>
    tpu.vector_store %arg9[%498, %c0_99, %c0_100], %501 {strides = array<i32>} : memref<8x2x32xf32, #tpu.memory_space<vmem>>, vector<1x2x32xf32>,
    %c8_i32 = arith.constant 8 : i32
    %c0_101 = arith.constant 0 : index
    %c0_102 = arith.constant 0 : index
    %502 = vector.load %arg6[%c0_101, %c0_102] : memref<32x8xf32, #tpu.memory_space<vmem>>, vector<32x8xf32>
    %c0_103 = arith.constant 0 : index
    %c0_104 = arith.constant 0 : index
    %c0_105 = arith.constant 0 : index
    %503 = vector.load %arg9[%c0_103, %c0_104, %c0_105] : memref<8x2x32xf32, #tpu.memory_space<vmem>>, vector<8x2x32xf32>
    %504 = math.tanh %503 : vector<8x2x32xf32>
    %505 = vector.shape_cast %504 : vector<8x2x32xf32> to vector<16x32xf32>
    %cst_106 = arith.constant dense<0.000000e+00> : vector<16x8xf32>
    %506 = tpu.matmul %505, %502, %cst_106 {dimension_numbers = #tpu.dot_dimension_numbers<[1], [0], [0], [1], [0, 0, 1, 1], [], []>} : vector<16x32xf32>, vector<32x8xf32>, vector<16x8xf32> -> vector<16x8xf32>
    %c0_107 = arith.constant 0 : index
    %c0_108 = arith.constant 0 : index
    %507 = vector.load %arg7[%c0_107, %c0_108] : memref<1x8xf32, #tpu.memory_space<vmem>>, vector<1x8xf32>
    %508 = vector.broadcast %507 : vector<1x8xf32> to vector<16x8xf32>
    %509 = arith.addf %506, %508 : vector<16x8xf32>
    %510 = arith.negf %509 : vector<16x8xf32>
    %511 = math.exp %510 : vector<16x8xf32>
    %cst_109 = arith.constant 1.000000e+00 : f32
    %512 = vector.broadcast %cst_109 : f32 to vector<16x8xf32>
    %513 = arith.addf %512, %511 : vector<16x8xf32>
    %514 = arith.divf %512, %513 : vector<16x8xf32>
    %515 = vector.shape_cast %514 : vector<16x8xf32> to vector<8x2x8xf32>
    %c0_110 = arith.constant 0 : index
    %c0_111 = arith.constant 0 : index
    %516 = vector.load %arg2[%c0_110, %c0_111] : memref<7x2xi32, #tpu.memory_space<vmem>>, vector<7x2xi32>
    %517 = tpu.iota {dimensions = array<i32: 2>} : vector<7x2x8xi32>
    %518 = vector.shape_cast %516 : vector<7x2xi32> to vector<7x2x1xi32>
    %519 = vector.broadcast %518 : vector<7x2x1xi32> to vector<7x2x8xi32>
    %520 = arith.cmpi eq, %517, %519 : vector<7x2x8xi32>
    %521 = arith.extui %520 : vector<7x2x8xi1> to vector<7x2x8xi32>
    %522 = arith.sitofp %521 : vector<7x2x8xi32> to vector<7x2x8xf32>
    %523 = vector.extract_strided_slice %515 {offsets = [0, 0, 0], sizes = [7, 2, 8], strides = [1, 1, 1]} : vector<8x2x8xf32> to vector<7x2x8xf32>
    %524 = arith.mulf %523, %522 : vector<7x2x8xf32>
    %cst_112 = arith.constant dense<0.000000e+00> : vector<7x2xf32>
    %525 = vector.multi_reduction <add>, %524, %cst_112 [2] : vector<7x2x8xf32> to vector<7x2xf32>
    %c0_113 = arith.constant 0 : index
    %c0_114 = arith.constant 0 : index
    %526 = vector.load %arg8[%c0_113, %c0_114] : memref<7x2xf32, #tpu.memory_space<vmem>>, vector<7x2xf32>
    tpu.vector_store %arg8[%c0_113, %c0_114], %525 {strides = array<i32>} : memref<7x2xf32, #tpu.memory_space<vmem>>, vector<7x2xf32>,
    return
  }
  func.func @transform_0(%arg0: i32) -> (i32, i32, i32) {
    %c0_i32 = arith.constant 0 : i32
    %c0_i32_0 = arith.constant 0 : i32
    %c0_i32_1 = arith.constant 0 : i32
    return %c0_i32, %arg0, %c0_i32_0 : i32, i32, i32
  }
  func.func @transform_1(%arg0: i32) -> (i32, i32) {
    %c0_i32 = arith.constant 0 : i32
    %c0_i32_0 = arith.constant 0 : i32
    return %c0_i32, %arg0 : i32, i32
  }
  func.func @transform_2(%arg0: i32) -> (i32, i32) {
    %c0_i32 = arith.constant 0 : i32
    %c0_i32_0 = arith.constant 0 : i32
    %c0_i32_1 = arith.constant 0 : i32
    return %c0_i32, %c0_i32_0 : i32, i32
  }
  func.func @transform_3(%arg0: i32) -> (i32, i32) {
    %c0_i32 = arith.constant 0 : i32
    %c0_i32_0 = arith.constant 0 : i32
    %c0_i32_1 = arith.constant 0 : i32
    return %c0_i32, %c0_i32_0 : i32, i32
  }
  func.func @transform_4(%arg0: i32) -> (i32, i32) {
    %c0_i32 = arith.constant 0 : i32
    %c0_i32_0 = arith.constant 0 : i32
    %c0_i32_1 = arith.constant 0 : i32
    return %c0_i32, %c0_i32_0 : i32, i32
  }
  func.func @transform_5(%arg0: i32) -> (i32, i32) {
    %c0_i32 = arith.constant 0 : i32
    %c0_i32_0 = arith.constant 0 : i32
    %c0_i32_1 = arith.constant 0 : i32
    return %c0_i32, %c0_i32_0 : i32, i32
  }
  func.func @transform_6(%arg0: i32) -> (i32, i32) {
    %c0_i32 = arith.constant 0 : i32
    %c0_i32_0 = arith.constant 0 : i32
    %c0_i32_1 = arith.constant 0 : i32
    return %c0_i32, %c0_i32_0 : i32, i32
  }
  func.func @transform_7(%arg0: i32) -> (i32, i32) {
    %c0_i32 = arith.constant 0 : i32
    %c0_i32_0 = arith.constant 0 : i32
    return %c0_i32, %arg0 : i32, i32
  }
}

</mosaic_0001>

<bundles_post_ra>
// kernel: dkt_forward.1
= control target key start
LH: loop header
LB: loop body
LE: loop exit
PB: predicated region body
PF: predicated region fallthrough
CT: control target
= control target key end

     0   :  { %v2812_v0 = vmov 0.0|0.0   ;;  %vm2813_vm0 = vmmov 0   ;;  %v2814_v4 = vmov 0.0   ;;  %s2815_s10 = smov 64   ;;  %s2816_s11 = smov 32   ;;  %vm46_vm1 = vcmask 261120   ;;  %s3302_s2 = inlined_call_operand.vmem [shape: f32[32,128], index: 2, kind: input, shape index: {}]   ;;  %s3303_s0 = inlined_call_operand.vmem [shape: f32[8,2,128], index: 0, kind: input, shape index: {}]   ;;  %s3304_s3 = inlined_call_operand.vmem [shape: f32[64,128], index: 3, kind: input, shape index: {}]   ;;  %s3305_s4 = inlined_call_operand.vmem [shape: f32[1,128], index: 4, kind: input, shape index: {}]   ;;  %s3306_s5 = inlined_call_operand.vmem [shape: f32[32,8], index: 5, kind: input, shape index: {}]   ;;  %s3307_s1 = inlined_call_operand.vmem [shape: s32[7,2], index: 1, kind: input, shape index: {}]   ;;  %s3308_s6 = inlined_call_operand.vmem [shape: f32[1,8], index: 6, kind: input, shape index: {}]   ;;  %s3309_s7 = inlined_call_operand.vmem [shape: f32[7,2], index: 7, kind: output, shape index: {}]  }
   0x1   :  { %2502 = vmatprep.subr.bf16.mxu0 %v2812_v0  ;;  %v26_v1 = vld [vmem:[%s3302_s2] sm:$0xff]  ;;  %v27_v2 = vld [vmem:[%s3302_s2 + $0x8] sm:$0xff]  ;;  %v28_v3 = vld [vmem:[%s3302_s2 + $0x10] sm:$0xff]  ;;  %2259 = vmatprep.mubr.msk.f32.mxu0 %vm2813_vm0, %v2814_v4  ;;  %vm150_vm2 = vcmask 523264   ;;  %vm252_vm3 = vcmask 254976   ;;  %vm2006_vm9 = vcmask 58368  }
   0x2   :  { %v2870_v5 = vpack.c.bf16 %v27_v2, %v26_v1  ;;  %v29_v6 = vld [vmem:[%s3302_s2 + $0x18] sm:$0xff]  ;;  %2508 = vmatprep.subr.bf16.mxu1 %v2812_v0  ;;  %2278 = vmatprep.mubr.msk.f32.mxu1 %vm2813_vm0, %v2814_v4  ;;  %v45_v8 = vld [vmem:[%s3303_s0] sm:$0x3]  ;;  %v31_v23 = vld [vmem:[%s3304_s3 + $0x8] sm:$0xff]  ;;  %vm2063_vm12 = vcmask 1041409   ;;  %vm2065_vm13 = vcmask 1042434  }
   0x3   :  { %v2879_v7 = vpack.c.bf16 %v29_v6, %v28_v3  ;;  %v30_v22 = vld [vmem:[%s3304_s3] sm:$0xff]  ;;  %v32_v24 = vld [vmem:[%s3304_s3 + $0x10] sm:$0xff]  ;;  %v33_v26 = vld [vmem:[%s3304_s3 + $0x18] sm:$0xff]  ;;  %vm2067_vm14 = vcmask 1043459   ;;  %vm2069_vm15 = vcmask 1044484  }
   0x4   :  { %2504 = vmatpush3.bf16.msra.mxu0 %v2870_v5  ;;  %v2908_v25 = vpack.c.bf16 %v31_v23, %v30_v22  ;;  %v2914_v27 = vpack.c.bf16 %v33_v26, %v32_v24  ;;  %v34_v28 = vld [vmem:[%s3304_s3 + $0x20] sm:$0xff]  ;;  %v35_v29 = vld [vmem:[%s3304_s3 + $0x28] sm:$0xff]  ;;  %v36_v31 = vld [vmem:[%s3304_s3 + $0x30] sm:$0xff] }
   0x5   :  { %2505 = vmatprep.subr.bf16.mxu0 %v2812_v0  ;;  %v2924_v30 = vpack.c.bf16 %v35_v29, %v34_v28  ;;  %v37_v32 = vld [vmem:[%s3304_s3 + $0x38] sm:$0xff]  ;;  %v2086_v39 = vld [vmem:[%s3303_s0 + $0x2] sm:$0x3]  ;;  %v2966_v40 = vld [vmem:[%s3305_s4] ss:$0 sm:$0xff] }
   0x6   :  { %2510 = vmatpush3.bf16.msra.mxu1 %v2908_v25  ;;  %v2935_v34 = vpack.c.bf16 %v37_v32, %v36_v31 }
   0x7   :  { %2511 = vmatprep.subr.bf16.mxu1 %v2812_v0 }
   0x8   :  { %2507 = vmatpush3.bf16.msra.mxu0 %v2879_v7 }
   0x9   :  { %2520 = vmatprep.subr.bf16.mxu0 %v2812_v0 }
   0xa   :  { %2513 = vmatpush3.bf16.msra.mxu1 %v2914_v27 }
   0xb   :  { %2260 = vmatmul.mubr.f32.vlgmr.msra.gmra.mrb[0].mxu0 %v2814_v4  ;;  %2514 = vmatprep.subr.bf16.mxu1 %v2812_v0 }
   0xc   :  { %2522 = vmatpush3.bf16.msra.mxu0 %v2870_v5  ;;  %2289 = vmatprep.mubr.msk.f32.mxu0 %vm2813_vm0, %v2814_v4 }
   0xd   :  { %2523 = vmatprep.subr.bf16.mxu0 %v2812_v0 }
   0xe   :  { %2516 = vmatpush3.bf16.msra.mxu1 %v2924_v30 }
   0xf   :  { %2517 = vmatprep.subr.bf16.mxu1 %v2812_v0 }
  0x10   :  { %2525 = vmatpush3.bf16.msra.mxu0 %v2879_v7 }
  0x11   :  { %2526 = vmatprep.subr.bf16.mxu0 %v2812_v0 }
  0x12   :  { %2519 = vmatpush3.bf16.msra.mxu1 %v2935_v34 }
  0x13   :  { %2538 = vmatprep.subr.bf16.mxu1 %v2812_v0 }
  0xde   :  { %v116_v9 = vpop.f32.mrb[0].mxu0 }
  0xdf   :  { %v120_v10 = vadd.f32 %v116_v9, %v45_v8  ;;  %v2261_v11 = vpop.f32.mrb[1].mxu0 }
  0xe1   :  { %2660 = vtanh.f32 %v120_v10  ;;  %v2083_v13 = vmul.f32 -1.442695, %v120_v10 }
  0xe3   :  { %2662 = vpow2.f32 %v2083_v13 }
  0xeb   :  { %v2661_v12 = vpop.eup %2660 }
  0xec   :  { %130 = vrot.lane.b32.xlu0 %v2661_v12, %s2815_s10 }
  0xed   :  { %v2663_v14 = vpop.eup %2662 }
  0xee   :  { %v124_v15 = vadd.f32 1.0, %v2663_v14 }
  0xf0   :  { %2664 = vrcp.f32 %v124_v15 }
  0xfa   :  { %v2665_v16 = vpop.eup %2664 }
  0xfb   :  { %v128_v19 = vmul.f32 0.0, %v2665_v16 }
 0x15e   :  { %v131_v17 = vpop.permute.xlu0 %130 }
 0x15f   :  { %v133_v18 = vmul.f32 %v2665_v16, %v131_v17 }
 0x161   :  { %135 = vrot.lane.b32.xlu0 %v133_v18, %s2816_s11 }
 0x1d3   :  { %v136_v20 = vpop.permute.xlu0 %135 }
 0x1d4   :  { %v2896_v21 = vadd.f32 %v136_v20, %v128_v19 }
 0x1d6   :  { %2666 = vtanh.f32 %v2896_v21 }
 0x1e0   :  { %v2667_v33 = vpop.eup %2666 }
 0x1e1   :  { %141 = vrot.lane.b32.xlu1 %v2667_v33, %s2815_s10 }
 0x253   :  { %v142_v35 = vpop.permute.xlu1 %141 }
 0x254   :  { %v144_v36 = vmul.f32 %v2665_v16, %v142_v35  ;;  %v2091_v16 = vld [vmem:[%s3303_s0 + $0x4] sm:$0x3] }
 0x256   :  { %146 = vrot.lane.b32.xlu1 %v144_v36, %s2816_s11 }
 0x2c8   :  { %v147_v37 = vpop.permute.xlu1 %146 }
 0x2c9   :  { %v149_v38 = vsel %vm46_vm1, %v147_v37, 0.0  ;;  %2290 = vmatmul.mubr.msk.f32.vlgmr.msra.gmra.mrb[2].mxu0 %vm46_vm1, %v147_v37 }
 0x2ca   :  { %2279 = vmatmul.mubr.msk.f32.vlgmr.msra.gmra.mrb[0].mxu1 %vm150_vm2, %v149_v38  ;;  %2528 = vmatpush3.bf16.msra.mxu0 %v2908_v25 }
 0x2cb   :  { %2529 = vmatprep.subr.bf16.mxu0 %v2812_v0  ;;  %2540 = vmatpush3.bf16.msra.mxu1 %v2870_v5 }
 0x2cc   :  { %2541 = vmatprep.subr.bf16.mxu1 %v2812_v0  ;;  %2319 = vmatprep.mubr.msk.f32.mxu1 %vm2813_vm0, %v2814_v4 }
 0x2cd   :  { %2308 = vmatprep.mubr.msk.f32.mxu0 %vm2813_vm0, %v2814_v4 }
 0x2ce   :  { %2531 = vmatpush3.bf16.msra.mxu0 %v2914_v27 }
 0x2cf   :  { %2532 = vmatprep.subr.bf16.mxu0 %v2812_v0  ;;  %2543 = vmatpush3.bf16.msra.mxu1 %v2879_v7 }
 0x2d0   :  { %2544 = vmatprep.subr.bf16.mxu1 %v2812_v0 }
 0x2d2   :  { %2534 = vmatpush3.bf16.msra.mxu0 %v2924_v30 }
 0x2d3   :  { %2535 = vmatprep.subr.bf16.mxu0 %v2812_v0 }
 0x2d6   :  { %2537 = vmatpush3.bf16.msra.mxu0 %v2935_v34 }
 0x2d7   :  { %2556 = vmatprep.subr.bf16.mxu0 %v2812_v0 }
 0x39c   :  { %v324_v41 = vpop.f32.mrb[2].mxu0 }
 0x39d   :  { %v328_v42 = vadd.f32 %v2086_v39, %v324_v41  ;;  %v220_v43 = vpop.f32.mrb[0].mxu1  ;;  %v2291_v44 = vpop.f32.mrb[3].mxu0 }
 0x39e   :  { %v221_v45 = vadd.f32 %v2966_v40, %v220_v43  ;;  %v2280_v46 = vpop.f32.mrb[1].mxu1 }
 0x39f   :  { %2668 = vtanh.f32 %v328_v42  ;;  %v2088_v49 = vmul.f32 -1.442695, %v328_v42 }
 0x3a0   :  { %2670 = vtanh.f32 %v221_v45  ;;  %v2085_v50 = vmul.f32 -1.442695, %v221_v45 }
 0x3a1   :  { %2672 = vpow2.f32 %v2088_v49 }
 0x3a2   :  { %2674 = vpow2.f32 %v2085_v50 }
 0x3a9   :  { %v2669_v47 = vpop.eup %2668 }
 0x3aa   :  { %v2671_v48 = vpop.eup %2670  ;;  %338 = vrot.lane.b32.xlu1 %v2669_v47, %s2815_s10 }
 0x3ab   :  { %233 = vrot.lane.b32.xlu0 %v2671_v48, %s2815_s10  ;;  %v2673_v51 = vpop.eup %2672 }
 0x3ac   :  { %v2675_v52 = vpop.eup %2674  ;;  %v332_v53 = vadd.f32 1.0, %v2673_v51 }
 0x3ad   :  { %v227_v54 = vadd.f32 1.0, %v2675_v52 }
 0x3ae   :  { %2676 = vrcp.f32 %v332_v53 }
 0x3af   :  { %2678 = vrcp.f32 %v227_v54 }
 0x3b8   :  { %v2677_v55 = vpop.eup %2676 }
 0x3b9   :  { %v2679_v57 = vpop.eup %2678  ;;  %v336_v61 = vmul.f32 %v2677_v55, %v2896_v21 }
 0x3ba   :  { %v231_v63 = vmul.f32 0.0, %v2679_v57 }
 0x41c   :  { %v339_v56 = vpop.permute.xlu1 %338 }
 0x41d   :  { %v341_v58 = vmul.f32 %v2677_v55, %v339_v56  ;;  %v234_v59 = vpop.permute.xlu0 %233 }
 0x41e   :  { %v236_v60 = vmul.f32 %v2679_v57, %v234_v59 }
 0x41f   :  { %343 = vrot.lane.b32.xlu1 %v341_v58, %s2816_s11 }
 0x420   :  { %238 = vrot.lane.b32.xlu0 %v236_v60, %s2816_s11 }
 0x491   :  { %v344_v62 = vpop.permute.xlu1 %343 }
 0x492   :  { %v2974_v1 = vadd.f32 %v344_v62, %v336_v61  ;;  %v239_v2 = vpop.permute.xlu0 %238 }
 0x493   :  { %v2976_v3 = vadd.f32 %v239_v2, %v231_v63 }
 0x494   :  { %2680 = vtanh.f32 %v2974_v1 }
 0x495   :  { %2682 = vtanh.f32 %v2976_v3 }
 0x49e   :  { %v2681_v6 = vpop.eup %2680 }
 0x49f   :  { %v2683_v8 = vpop.eup %2682  ;;  %349 = vrot.lane.b32.xlu1 %v2681_v6, %s2815_s10 }
 0x4a0   :  { %244 = vrot.lane.b32.xlu0 %v2683_v8, %s2815_s10 }
 0x511   :  { %v350_v9 = vpop.permute.xlu1 %349 }
 0x512   :  { %v352_v10 = vmul.f32 %v2677_v55, %v350_v9  ;;  %v245_v11 = vpop.permute.xlu0 %244 }
 0x513   :  { %v2982_v12 = vmul.f32 %v2679_v57, %v245_v11  ;;  %v2096_v57 = vld [vmem:[%s3303_s0 + $0x6] sm:$0x3] }
 0x514   :  { %354 = vrot.lane.b32.xlu0 %v352_v10, %s2816_s11 }
 0x515   :  { %357 = vrot.lane.b32.xlu1 %v2982_v12, %s2815_s10 }
 0x586   :  { %v355_v13 = vpop.permute.xlu0 %354 }
 0x587   :  { %v358_v14 = vpop.permute.xlu1 %357  ;;  %2320 = vmatmul.mubr.msk.f32.vlgmr.msra.gmra.mrb[2].mxu1 %vm46_vm1, %v355_v13 }
 0x588   :  { %v360_v15 = vsel %vm46_vm1, %v355_v13, %v358_v14  ;;  %2546 = vmatpush3.bf16.msra.mxu1 %v2908_v25  ;;  %2338 = vmatprep.mubr.msk.f32.mxu1 %vm2813_vm0, %v2814_v4 }
 0x589   :  { %2309 = vmatmul.mubr.msk.f32.vlgmr.msra.gmra.mrb[4].mxu0 %vm150_vm2, %v360_v15  ;;  %2547 = vmatprep.subr.bf16.mxu1 %v2812_v0 }
 0x58a   :  { %2558 = vmatpush3.bf16.msra.mxu0 %v2870_v5  ;;  %2349 = vmatprep.mubr.msk.f32.mxu0 %vm2813_vm0, %v2814_v4 }
 0x58b   :  { %2559 = vmatprep.subr.bf16.mxu0 %v2812_v0 }
 0x58c   :  { %2549 = vmatpush3.bf16.msra.mxu1 %v2914_v27 }
 0x58d   :  { %2550 = vmatprep.subr.bf16.mxu1 %v2812_v0 }
 0x58e   :  { %2561 = vmatpush3.bf16.msra.mxu0 %v2879_v7 }
 0x58f   :  { %2562 = vmatprep.subr.bf16.mxu0 %v2812_v0 }
 0x590   :  { %2552 = vmatpush3.bf16.msra.mxu1 %v2924_v30 }
 0x591   :  { %2553 = vmatprep.subr.bf16.mxu1 %v2812_v0 }
 0x594   :  { %2555 = vmatpush3.bf16.msra.mxu1 %v2935_v34 }
 0x595   :  { %2574 = vmatprep.subr.bf16.mxu1 %v2812_v0 }
 0x65a   :  { %v534_v17 = vpop.f32.mrb[2].mxu1 }
 0x65b   :  { %v538_v18 = vadd.f32 %v2091_v16, %v534_v17  ;;  %v2321_v19 = vpop.f32.mrb[3].mxu1 }
 0x65c   :  { %v430_v20 = vpop.f32.mrb[4].mxu0 }
 0x65d   :  { %2684 = vtanh.f32 %v538_v18  ;;  %v431_v21 = vadd.f32 %v2966_v40, %v430_v20  ;;  %v2310_v22 = vpop.f32.mrb[5].mxu0  ;;  %v2093_v26 = vmul.f32 -1.442695, %v538_v18 }
 0x65f   :  { %2686 = vtanh.f32 %v431_v21  ;;  %v2090_v28 = vmul.f32 -1.442695, %v431_v21 }
 0x660   :  { %2688 = vpow2.f32 %v2093_v26 }
 0x661   :  { %2690 = vpow2.f32 %v2090_v28 }
 0x667   :  { %v2685_v23 = vpop.eup %2684 }
 0x668   :  { %548 = vrot.lane.b32.xlu1 %v2685_v23, %s2815_s10 }
 0x669   :  { %v2687_v24 = vpop.eup %2686 }
 0x66a   :  { %443 = vrot.lane.b32.xlu0 %v2687_v24, %s2815_s10  ;;  %v2689_v29 = vpop.eup %2688 }
 0x66b   :  { %v2691_v31 = vpop.eup %2690  ;;  %v542_v32 = vadd.f32 1.0, %v2689_v29 }
 0x66c   :  { %v437_v33 = vadd.f32 1.0, %v2691_v31 }
 0x66d   :  { %2692 = vrcp.f32 %v542_v32 }
 0x66e   :  { %2694 = vrcp.f32 %v437_v33 }
 0x677   :  { %v2693_v35 = vpop.eup %2692 }
 0x678   :  { %v2695_v38 = vpop.eup %2694  ;;  %v546_v42 = vmul.f32 %v2693_v35, %v2974_v1 }
 0x679   :  { %v441_v45 = vmul.f32 %v2695_v38, %v2976_v3 }
 0x6da   :  { %v549_v36 = vpop.permute.xlu1 %548 }
 0x6db   :  { %v551_v37 = vmul.f32 %v2693_v35, %v549_v36 }
 0x6dc   :  { %v444_v39 = vpop.permute.xlu0 %443 }
 0x6dd   :  { %553 = vrot.lane.b32.xlu1 %v551_v37, %s2816_s11  ;;  %v446_v41 = vmul.f32 %v2695_v38, %v444_v39 }
 0x6df   :  { %448 = vrot.lane.b32.xlu0 %v446_v41, %s2816_s11 }
 0x74f   :  { %v554_v43 = vpop.permute.xlu1 %553 }
 0x750   :  { %v3015_v44 = vadd.f32 %v554_v43, %v546_v42 }
 0x751   :  { %v449_v46 = vpop.permute.xlu0 %448 }
 0x752   :  { %2696 = vtanh.f32 %v3015_v44  ;;  %v3019_v47 = vadd.f32 %v449_v46, %v441_v45 }
 0x754   :  { %2698 = vtanh.f32 %v3019_v47 }
 0x75c   :  { %v2697_v48 = vpop.eup %2696 }
 0x75d   :  { %559 = vrot.lane.b32.xlu1 %v2697_v48, %s2815_s10 }
 0x75e   :  { %v2699_v49 = vpop.eup %2698 }
 0x75f   :  { %454 = vrot.lane.b32.xlu0 %v2699_v49, %s2815_s10 }
 0x7cf   :  { %v560_v50 = vpop.permute.xlu1 %559 }
 0x7d0   :  { %v562_v51 = vmul.f32 %v2693_v35, %v560_v50 }
 0x7d1   :  { %v455_v52 = vpop.permute.xlu0 %454 }
 0x7d2   :  { %564 = vrot.lane.b32.xlu0 %v562_v51, %s2816_s11  ;;  %v3025_v53 = vmul.f32 %v2695_v38, %v455_v52  ;;  %v2101_v38 = vld [vmem:[%s3303_s0 + $0x8] sm:$0x3] }
 0x7d4   :  { %567 = vrot.lane.b32.xlu1 %v3025_v53, %s2815_s10 }
 0x844   :  { %v565_v54 = vpop.permute.xlu0 %564 }
 0x845   :  { %2350 = vmatmul.mubr.msk.f32.vlgmr.msra.gmra.mrb[6].mxu0 %vm46_vm1, %v565_v54 }
 0x846   :  { %2564 = vmatpush3.bf16.msra.mxu0 %v2908_v25  ;;  %2368 = vmatprep.mubr.msk.f32.mxu0 %vm2813_vm0, %v2814_v4  ;;  %v568_v55 = vpop.permute.xlu1 %567 }
 0x847   :  { %2565 = vmatprep.subr.bf16.mxu0 %v2812_v0  ;;  %v570_v56 = vsel %vm46_vm1, %v565_v54, %v568_v55 }
 0x848   :  { %2339 = vmatmul.mubr.msk.f32.vlgmr.msra.gmra.mrb[4].mxu1 %vm150_vm2, %v570_v56 }
 0x849   :  { %2576 = vmatpush3.bf16.msra.mxu1 %v2870_v5  ;;  %2379 = vmatprep.mubr.msk.f32.mxu1 %vm2813_vm0, %v2814_v4 }
 0x84a   :  { %2567 = vmatpush3.bf16.msra.mxu0 %v2914_v27  ;;  %2577 = vmatprep.subr.bf16.mxu1 %v2812_v0 }
 0x84b   :  { %2568 = vmatprep.subr.bf16.mxu0 %v2812_v0 }
 0x84d   :  { %2579 = vmatpush3.bf16.msra.mxu1 %v2879_v7 }
 0x84e   :  { %2570 = vmatpush3.bf16.msra.mxu0 %v2924_v30  ;;  %2580 = vmatprep.subr.bf16.mxu1 %v2812_v0 }
 0x84f   :  { %2571 = vmatprep.subr.bf16.mxu0 %v2812_v0 }
 0x852   :  { %2573 = vmatpush3.bf16.msra.mxu0 %v2935_v34 }
 0x853   :  { %2592 = vmatprep.subr.bf16.mxu0 %v2812_v0 }
 0x918   :  { %v744_v58 = vpop.f32.mrb[6].mxu0 }
 0x919   :  { %v748_v59 = vadd.f32 %v2096_v57, %v744_v58  ;;  %v2351_v60 = vpop.f32.mrb[7].mxu0 }
 0x91b   :  { %2700 = vtanh.f32 %v748_v59  ;;  %v640_v61 = vpop.f32.mrb[4].mxu1  ;;  %v2098_v3 = vmul.f32 -1.442695, %v748_v59 }
 0x91c   :  { %v641_v62 = vadd.f32 %v2966_v40, %v640_v61  ;;  %v2340_v63 = vpop.f32.mrb[5].mxu1 }
 0x91e   :  { %2702 = vtanh.f32 %v641_v62  ;;  %v2095_v6 = vmul.f32 -1.442695, %v641_v62 }
 0x91f   :  { %2704 = vpow2.f32 %v2098_v3 }
 0x920   :  { %2706 = vpow2.f32 %v2095_v6 }
 0x925   :  { %v2701_v1 = vpop.eup %2700 }
 0x926   :  { %758 = vrot.lane.b32.xlu1 %v2701_v1, %s2815_s10 }
 0x928   :  { %v2703_v2 = vpop.eup %2702 }
 0x929   :  { %653 = vrot.lane.b32.xlu0 %v2703_v2, %s2815_s10  ;;  %v2705_v8 = vpop.eup %2704 }
 0x92a   :  { %v752_v9 = vadd.f32 1.0, %v2705_v8  ;;  %v2707_v10 = vpop.eup %2706 }
 0x92b   :  { %v647_v11 = vadd.f32 1.0, %v2707_v10 }
 0x92c   :  { %2708 = vrcp.f32 %v752_v9 }
 0x92d   :  { %2710 = vrcp.f32 %v647_v11 }
 0x936   :  { %v2709_v13 = vpop.eup %2708 }
 0x937   :  { %v2711_v16 = vpop.eup %2710  ;;  %v756_v19 = vmul.f32 %v2709_v13, %v3015_v44 }
 0x938   :  { %v651_v22 = vmul.f32 %v2711_v16, %v3019_v47 }
 0x998   :  { %v759_v14 = vpop.permute.xlu1 %758 }
 0x999   :  { %v761_v15 = vmul.f32 %v2709_v13, %v759_v14 }
 0x99b   :  { %763 = vrot.lane.b32.xlu1 %v761_v15, %s2816_s11  ;;  %v654_v17 = vpop.permute.xlu0 %653 }
 0x99c   :  { %v656_v18 = vmul.f32 %v2711_v16, %v654_v17  ;;  %v2106_v17 = vld [vmem:[%s3303_s0 + $0xa] sm:$0x3] }
 0x99e   :  { %658 = vrot.lane.b32.xlu0 %v656_v18, %s2816_s11 }
 0xa0d   :  { %v764_v20 = vpop.permute.xlu1 %763 }
 0xa0e   :  { %v3057_v21 = vadd.f32 %v764_v20, %v756_v19 }
 0xa10   :  { %2712 = vtanh.f32 %v3057_v21  ;;  %v659_v23 = vpop.permute.xlu0 %658 }
 0xa11   :  { %v3061_v24 = vadd.f32 %v659_v23, %v651_v22 }
 0xa13   :  { %2714 = vtanh.f32 %v3061_v24 }
 0xa1a   :  { %v2713_v26 = vpop.eup %2712 }
 0xa1b   :  { %769 = vrot.lane.b32.xlu1 %v2713_v26, %s2815_s10 }
 0xa1d   :  { %v2715_v28 = vpop.eup %2714 }
 0xa1e   :  { %664 = vrot.lane.b32.xlu0 %v2715_v28, %s2815_s10 }
 0xa8d   :  { %v770_v29 = vpop.permute.xlu1 %769 }
 0xa8e   :  { %v772_v31 = vmul.f32 %v2709_v13, %v770_v29 }
 0xa90   :  { %774 = vrot.lane.b32.xlu0 %v772_v31, %s2816_s11  ;;  %v665_v32 = vpop.permute.xlu0 %664 }
 0xa91   :  { %v3067_v33 = vmul.f32 %v2711_v16, %v665_v32 }
 0xa93   :  { %777 = vrot.lane.b32.xlu1 %v3067_v33, %s2815_s10 }
 0xb02   :  { %v775_v35 = vpop.permute.xlu0 %774 }
 0xb03   :  { %2380 = vmatmul.mubr.msk.f32.vlgmr.msra.gmra.mrb[6].mxu1 %vm46_vm1, %v775_v35 }
 0xb04   :  { %2582 = vmatpush3.bf16.msra.mxu1 %v2908_v25  ;;  %2398 = vmatprep.mubr.msk.f32.mxu1 %vm2813_vm0, %v2814_v4 }
 0xb05   :  { %2583 = vmatprep.subr.bf16.mxu1 %v2812_v0  ;;  %v778_v36 = vpop.permute.xlu1 %777 }
 0xb06   :  { %v780_v37 = vsel %vm46_vm1, %v775_v35, %v778_v36 }
 0xb07   :  { %2369 = vmatmul.mubr.msk.f32.vlgmr.msra.gmra.mrb[8].mxu0 %vm150_vm2, %v780_v37 }
 0xb08   :  { %2585 = vmatpush3.bf16.msra.mxu1 %v2914_v27  ;;  %2594 = vmatpush3.bf16.msra.mxu0 %v2870_v5 }
 0xb09   :  { %2586 = vmatprep.subr.bf16.mxu1 %v2812_v0  ;;  %2595 = vmatprep.subr.bf16.mxu0 %v2812_v0 }
 0xb0a   :  { %2409 = vmatprep.mubr.msk.f32.mxu0 %vm2813_vm0, %v2814_v4 }
 0xb0c   :  { %2588 = vmatpush3.bf16.msra.mxu1 %v2924_v30  ;;  %2597 = vmatpush3.bf16.msra.mxu0 %v2879_v7 }
 0xb0d   :  { %2589 = vmatprep.subr.bf16.mxu1 %v2812_v0  ;;  %2598 = vmatprep.subr.bf16.mxu0 %v2812_v0 }
 0xb10   :  { %2591 = vmatpush3.bf16.msra.mxu1 %v2935_v34 }
 0xb11   :  { %2610 = vmatprep.subr.bf16.mxu1 %v2812_v0 }
 0xbd6   :  { %v954_v39 = vpop.f32.mrb[6].mxu1 }
 0xbd7   :  { %v958_v41 = vadd.f32 %v2101_v38, %v954_v39  ;;  %v2381_v42 = vpop.f32.mrb[7].mxu1 }
 0xbd9   :  { %2716 = vtanh.f32 %v958_v41  ;;  %v2103_v48 = vmul.f32 -1.442695, %v958_v41 }
 0xbda   :  { %v850_v43 = vpop.f32.mrb[8].mxu0 }
 0xbdb   :  { %v851_v44 = vadd.f32 %v2966_v40, %v850_v43  ;;  %v2370_v45 = vpop.f32.mrb[9].mxu0 }
 0xbdd   :  { %2718 = vtanh.f32 %v851_v44  ;;  %v2100_v49 = vmul.f32 -1.442695, %v851_v44 }
 0xbde   :  { %2720 = vpow2.f32 %v2103_v48 }
 0xbdf   :  { %2722 = vpow2.f32 %v2100_v49 }
 0xbe3   :  { %v2717_v46 = vpop.eup %2716 }
 0xbe4   :  { %968 = vrot.lane.b32.xlu1 %v2717_v46, %s2815_s10 }
 0xbe7   :  { %v2719_v47 = vpop.eup %2718 }
 0xbe8   :  { %863 = vrot.lane.b32.xlu0 %v2719_v47, %s2815_s10  ;;  %v2721_v50 = vpop.eup %2720 }
 0xbe9   :  { %v962_v51 = vadd.f32 1.0, %v2721_v50  ;;  %v2723_v52 = vpop.eup %2722 }
 0xbea   :  { %v857_v54 = vadd.f32 1.0, %v2723_v52 }
 0xbeb   :  { %2724 = vrcp.f32 %v962_v51 }
 0xbec   :  { %2726 = vrcp.f32 %v857_v54 }
 0xbf5   :  { %v2725_v55 = vpop.eup %2724 }
 0xbf6   :  { %v2727_v58 = vpop.eup %2726  ;;  %v966_v61 = vmul.f32 %v2725_v55, %v3057_v21 }
 0xbf7   :  { %v861_v1 = vmul.f32 %v2727_v58, %v3061_v24 }
 0xc56   :  { %v969_v56 = vpop.permute.xlu1 %968 }
 0xc57   :  { %v971_v57 = vmul.f32 %v2725_v55, %v969_v56 }
 0xc59   :  { %973 = vrot.lane.b32.xlu1 %v971_v57, %s2816_s11 }
 0xc5a   :  { %v864_v59 = vpop.permute.xlu0 %863 }
 0xc5b   :  { %v866_v60 = vmul.f32 %v2727_v58, %v864_v59 }
 0xc5d   :  { %868 = vrot.lane.b32.xlu0 %v866_v60, %s2816_s11  ;;  %v2111_v60 = vld [vmem:[%s3303_s0 + $0xc] sm:$0x3] }
 0xccb   :  { %v974_v62 = vpop.permute.xlu1 %973 }
 0xccc   :  { %v3099_v63 = vadd.f32 %v974_v62, %v966_v61 }
 0xcce   :  { %2728 = vtanh.f32 %v3099_v63 }
 0xccf   :  { %v869_v2 = vpop.permute.xlu0 %868 }
 0xcd0   :  { %v3103_v3 = vadd.f32 %v869_v2, %v861_v1 }
 0xcd2   :  { %2730 = vtanh.f32 %v3103_v3 }
 0xcd8   :  { %v2729_v6 = vpop.eup %2728 }
 0xcd9   :  { %979 = vrot.lane.b32.xlu1 %v2729_v6, %s2815_s10 }
 0xcdc   :  { %v2731_v8 = vpop.eup %2730 }
 0xcdd   :  { %874 = vrot.lane.b32.xlu0 %v2731_v8, %s2815_s10 }
 0xd4b   :  { %v980_v9 = vpop.permute.xlu1 %979 }
 0xd4c   :  { %v982_v10 = vmul.f32 %v2725_v55, %v980_v9 }
 0xd4e   :  { %984 = vrot.lane.b32.xlu0 %v982_v10, %s2816_s11 }
 0xd4f   :  { %v875_v11 = vpop.permute.xlu0 %874 }
 0xd50   :  { %v3109_v13 = vmul.f32 %v2727_v58, %v875_v11 }
 0xd52   :  { %987 = vrot.lane.b32.xlu1 %v3109_v13, %s2815_s10 }
 0xdc0   :  { %v985_v14 = vpop.permute.xlu0 %984 }
 0xdc1   :  { %2410 = vmatmul.mubr.msk.f32.vlgmr.msra.gmra.mrb[10].mxu0 %vm46_vm1, %v985_v14 }
 0xdc2   :  { %2600 = vmatpush3.bf16.msra.mxu0 %v2908_v25  ;;  %2428 = vmatprep.mubr.msk.f32.mxu0 %vm2813_vm0, %v2814_v4 }
 0xdc3   :  { %2601 = vmatprep.subr.bf16.mxu0 %v2812_v0 }
 0xdc4   :  { %v988_v15 = vpop.permute.xlu1 %987 }
 0xdc5   :  { %v990_v16 = vsel %vm46_vm1, %v985_v14, %v988_v15 }
 0xdc6   :  { %2603 = vmatpush3.bf16.msra.mxu0 %v2914_v27  ;;  %2399 = vmatmul.mubr.msk.f32.vlgmr.msra.gmra.mrb[8].mxu1 %vm150_vm2, %v990_v16 }
 0xdc7   :  { %2604 = vmatprep.subr.bf16.mxu0 %v2812_v0  ;;  %2612 = vmatpush3.bf16.msra.mxu1 %v2870_v5 }
 0xdc8   :  { %2439 = vmatprep.mubr.msk.f32.mxu1 %vm2813_vm0, %v2814_v4  ;;  %2613 = vmatprep.subr.bf16.mxu1 %v2812_v0 }
 0xdca   :  { %2606 = vmatpush3.bf16.msra.mxu0 %v2924_v30 }
 0xdcb   :  { %2607 = vmatprep.subr.bf16.mxu0 %v2812_v0  ;;  %2615 = vmatpush3.bf16.msra.mxu1 %v2879_v7 }
 0xdcc   :  { %2616 = vmatprep.subr.bf16.mxu1 %v2812_v0 }
 0xdce   :  { %2609 = vmatpush3.bf16.msra.mxu0 %v2935_v34 }
 0xdcf   :  { %2628 = vmatprep.subr.bf16.mxu0 %v2812_v0 }
 0xe94   :  { %v1164_v18 = vpop.f32.mrb[10].mxu0 }
 0xe95   :  { %v1168_v19 = vadd.f32 %v2106_v17, %v1164_v18  ;;  %v2411_v20 = vpop.f32.mrb[11].mxu0 }
 0xe97   :  { %2732 = vtanh.f32 %v1168_v19  ;;  %v2108_v28 = vmul.f32 -1.442695, %v1168_v19 }
 0xe99   :  { %v1060_v21 = vpop.f32.mrb[8].mxu1 }
 0xe9a   :  { %v1061_v22 = vadd.f32 %v2966_v40, %v1060_v21  ;;  %v2400_v23 = vpop.f32.mrb[9].mxu1 }
 0xe9c   :  { %2734 = vtanh.f32 %v1061_v22  ;;  %v2105_v29 = vmul.f32 -1.442695, %v1061_v22 }
 0xe9d   :  { %2736 = vpow2.f32 %v2108_v28 }
 0xe9e   :  { %2738 = vpow2.f32 %v2105_v29 }
 0xea1   :  { %v2733_v24 = vpop.eup %2732 }
 0xea2   :  { %1178 = vrot.lane.b32.xlu1 %v2733_v24, %s2815_s10 }
 0xea6   :  { %v2735_v26 = vpop.eup %2734 }
 0xea7   :  { %1073 = vrot.lane.b32.xlu0 %v2735_v26, %s2815_s10  ;;  %v2737_v31 = vpop.eup %2736 }
 0xea8   :  { %v1172_v32 = vadd.f32 1.0, %v2737_v31  ;;  %v2739_v35 = vpop.eup %2738 }
 0xea9   :  { %v1067_v36 = vadd.f32 1.0, %v2739_v35 }
 0xeaa   :  { %2740 = vrcp.f32 %v1172_v32 }
 0xeab   :  { %2742 = vrcp.f32 %v1067_v36 }
 0xeb4   :  { %v2741_v37 = vpop.eup %2740 }
 0xeb5   :  { %v2743_v41 = vpop.eup %2742  ;;  %v1176_v44 = vmul.f32 %v2741_v37, %v3099_v63 }
 0xeb6   :  { %v1071_v47 = vmul.f32 %v2743_v41, %v3103_v3 }
 0xf14   :  { %v1179_v38 = vpop.permute.xlu1 %1178 }
 0xf15   :  { %v1181_v39 = vmul.f32 %v2741_v37, %v1179_v38 }
 0xf17   :  { %1183 = vrot.lane.b32.xlu1 %v1181_v39, %s2816_s11 }
 0xf19   :  { %v1074_v42 = vpop.permute.xlu0 %1073 }
 0xf1a   :  { %v1076_v43 = vmul.f32 %v2743_v41, %v1074_v42 }
 0xf1c   :  { %1078 = vrot.lane.b32.xlu0 %v1076_v43, %s2816_s11 }
 0xf89   :  { %v1184_v45 = vpop.permute.xlu1 %1183 }
 0xf8a   :  { %v3141_v46 = vadd.f32 %v1184_v45, %v1176_v44 }
 0xf8c   :  { %2744 = vtanh.f32 %v3141_v46 }
 0xf8e   :  { %v1079_v48 = vpop.permute.xlu0 %1078 }
 0xf8f   :  { %v3145_v49 = vadd.f32 %v1079_v48, %v1071_v47 }
 0xf91   :  { %2746 = vtanh.f32 %v3145_v49 }
 0xf96   :  { %v2745_v50 = vpop.eup %2744 }
 0xf97   :  { %1189 = vrot.lane.b32.xlu1 %v2745_v50, %s2815_s10 }
 0xf9b   :  { %v2747_v51 = vpop.eup %2746 }
 0xf9c   :  { %1084 = vrot.lane.b32.xlu0 %v2747_v51, %s2815_s10 }
0x1009   :  { %v1190_v52 = vpop.permute.xlu1 %1189 }
0x100a   :  { %v1192_v54 = vmul.f32 %v2741_v37, %v1190_v52 }
0x100c   :  { %1194 = vrot.lane.b32.xlu0 %v1192_v54, %s2816_s11 }
0x100e   :  { %v1085_v55 = vpop.permute.xlu0 %1084 }
0x100f   :  { %v3151_v56 = vmul.f32 %v2743_v41, %v1085_v55 }
0x1011   :  { %1197 = vrot.lane.b32.xlu1 %v3151_v56, %s2815_s10 }
0x107e   :  { %v1195_v57 = vpop.permute.xlu0 %1194 }
0x107f   :  { %2440 = vmatmul.mubr.msk.f32.vlgmr.msra.gmra.mrb[10].mxu1 %vm46_vm1, %v1195_v57 }
0x1080   :  { %2618 = vmatpush3.bf16.msra.mxu1 %v2908_v25  ;;  %2458 = vmatprep.mubr.msk.f32.mxu1 %vm2813_vm0, %v2814_v4 }
0x1081   :  { %2619 = vmatprep.subr.bf16.mxu1 %v2812_v0 }
0x1083   :  { %v1198_v58 = vpop.permute.xlu1 %1197 }
0x1084   :  { %2621 = vmatpush3.bf16.msra.mxu1 %v2914_v27  ;;  %v1200_v59 = vsel %vm46_vm1, %v1195_v57, %v1198_v58 }
0x1085   :  { %2622 = vmatprep.subr.bf16.mxu1 %v2812_v0  ;;  %2429 = vmatmul.mubr.msk.f32.vlgmr.msra.gmra.mrb[12].mxu0 %vm150_vm2, %v1200_v59 }
0x1086   :  { %2630 = vmatpush3.bf16.msra.mxu0 %v2870_v5  ;;  %2469 = vmatprep.mubr.msk.f32.mxu0 %vm2813_vm0, %v2814_v4 }
0x1087   :  { %2631 = vmatprep.subr.bf16.mxu0 %v2812_v0 }
0x1088   :  { %2624 = vmatpush3.bf16.msra.mxu1 %v2924_v30 }
0x1089   :  { %2625 = vmatprep.subr.bf16.mxu1 %v2812_v0 }
0x108a   :  { %2633 = vmatpush3.bf16.msra.mxu0 %v2879_v7 }
0x108b   :  { %2634 = vmatprep.subr.bf16.mxu0 %v2812_v0 }
0x108c   :  { %2627 = vmatpush3.bf16.msra.mxu1 %v2935_v34 }
0x1152   :  { %v1374_v5 = vpop.f32.mrb[10].mxu1 }
0x1153   :  { %v1378_v61 = vadd.f32 %v2111_v60, %v1374_v5  ;;  %v2441_v62 = vpop.f32.mrb[11].mxu1 }
0x1155   :  { %2748 = vtanh.f32 %v1378_v61  ;;  %v2113_v6 = vmul.f32 -1.442695, %v1378_v61 }
0x1158   :  { %v1270_v63 = vpop.f32.mrb[12].mxu0 }
0x1159   :  { %v1271_v1 = vadd.f32 %v2966_v40, %v1270_v63  ;;  %v2430_v2 = vpop.f32.mrb[13].mxu0 }
0x115b   :  { %2750 = vtanh.f32 %v1271_v1  ;;  %v2110_v8 = vmul.f32 -1.442695, %v1271_v1 }
0x115c   :  { %2752 = vpow2.f32 %v2113_v6 }
0x115d   :  { %2754 = vpow2.f32 %v2110_v8 }
0x115f   :  { %v2749_v3 = vpop.eup %2748 }
0x1160   :  { %1388 = vrot.lane.b32.xlu1 %v2749_v3, %s2815_s10 }
0x1165   :  { %v2751_v7 = vpop.eup %2750 }
0x1166   :  { %1283 = vrot.lane.b32.xlu0 %v2751_v7, %s2815_s10  ;;  %v2753_v9 = vpop.eup %2752 }
0x1167   :  { %v1382_v10 = vadd.f32 1.0, %v2753_v9  ;;  %v2755_v11 = vpop.eup %2754 }
0x1168   :  { %v1277_v14 = vadd.f32 1.0, %v2755_v11 }
0x1169   :  { %2756 = vrcp.f32 %v1382_v10 }
0x116a   :  { %2758 = vrcp.f32 %v1277_v14 }
0x1173   :  { %v2757_v15 = vpop.eup %2756 }
0x1174   :  { %v2759_v18 = vpop.eup %2758  ;;  %v1386_v21 = vmul.f32 %v2757_v15, %v3141_v46 }
0x1175   :  { %v1281_v24 = vmul.f32 %v2759_v18, %v3145_v49 }
0x11d2   :  { %v1389_v16 = vpop.permute.xlu1 %1388 }
0x11d3   :  { %v1391_v17 = vmul.f32 %v2757_v15, %v1389_v16 }
0x11d5   :  { %1393 = vrot.lane.b32.xlu1 %v1391_v17, %s2816_s11 }
0x11d8   :  { %v1284_v19 = vpop.permute.xlu0 %1283 }
0x11d9   :  { %v1286_v20 = vmul.f32 %v2759_v18, %v1284_v19 }
0x11db   :  { %1288 = vrot.lane.b32.xlu0 %v1286_v20, %s2816_s11 }
0x1247   :  { %v1394_v22 = vpop.permute.xlu1 %1393 }
0x1248   :  { %v1396_v23 = vadd.f32 %v1394_v22, %v1386_v21 }
0x124a   :  { %2760 = vtanh.f32 %v1396_v23 }
0x124d   :  { %v1289_v26 = vpop.permute.xlu0 %1288 }
0x124e   :  { %v1291_v28 = vadd.f32 %v1289_v26, %v1281_v24 }
0x1250   :  { %2762 = vtanh.f32 %v1291_v28 }
0x1254   :  { %v2761_v29 = vpop.eup %2760 }
0x1255   :  { %1399 = vrot.lane.b32.xlu1 %v2761_v29, %s2815_s10 }
0x125a   :  { %v2763_v31 = vpop.eup %2762 }
0x125b   :  { %1294 = vrot.lane.b32.xlu0 %v2763_v31, %s2815_s10 }
0x12c7   :  { %v1400_v32 = vpop.permute.xlu1 %1399 }
0x12c8   :  { %v1402_v35 = vmul.f32 %v2757_v15, %v1400_v32 }
0x12ca   :  { %1404 = vrot.lane.b32.xlu0 %v1402_v35, %s2816_s11  ;;  %v1725_v35 = vld [vmem:[%s3306_s5 + $0x8] sm:$0xff] }
0x12cd   :  { %v1295_v36 = vpop.permute.xlu0 %1294 }
0x12ce   :  { %v3186_v37 = vmul.f32 %v2759_v18, %v1295_v36  ;;  %v1726_v36 = vld [vmem:[%s3306_s5 + $0x10] sm:$0xff] }
0x12d0   :  { %1407 = vrot.lane.b32.xlu1 %v3186_v37, %s2815_s10 }
0x133c   :  { %v1405_v38 = vpop.permute.xlu0 %1404 }
0x133d   :  { %2470 = vmatmul.mubr.msk.f32.vlgmr.msra.gmra.mrb[14].mxu0 %vm46_vm1, %v1405_v38 }
0x133e   :  { %2636 = vmatpush3.bf16.msra.mxu0 %v2908_v25  ;;  %2488 = vmatprep.mubr.msk.f32.mxu0 %vm2813_vm0, %v2814_v4  ;;  %v2116_v25 = vld [vmem:[%s3303_s0 + $0xe] sm:$0x3]  ;;  %vm2071_vm0 = vcmask 1045509  }
0x133f   :  { %2637 = vmatprep.subr.bf16.mxu0 %v2812_v0 }
0x1342   :  { %2639 = vmatpush3.bf16.msra.mxu0 %v2914_v27  ;;  %v1408_v39 = vpop.permute.xlu1 %1407 }
0x1343   :  { %2640 = vmatprep.subr.bf16.mxu0 %v2812_v0  ;;  %v1410_v41 = vsel %vm46_vm1, %v1405_v38, %v1408_v39 }
0x1344   :  { %2459 = vmatmul.mubr.msk.f32.vlgmr.msra.gmra.mrb[12].mxu1 %vm150_vm2, %v1410_v41 }
0x1346   :  { %2642 = vmatpush3.bf16.msra.mxu0 %v2924_v30 }
0x1347   :  { %2643 = vmatprep.subr.bf16.mxu0 %v2812_v0 }
0x134a   :  { %2645 = vmatpush3.bf16.msra.mxu0 %v2935_v34 }
0x1410   :  { %v1584_v42 = vpop.f32.mrb[14].mxu0 }
0x1411   :  { %v1588_v43 = vadd.f32 %v2116_v25, %v1584_v42  ;;  %v2471_v27 = vpop.f32.mrb[15].mxu0  ;;  %v1764_v42 = vlaneseq }
0x1413   :  { %2764 = vtanh.f32 %v1588_v43  ;;  %v2118_v0 = vmul.f32 -1.442695, %v1588_v43 }
0x1417   :  { %v1480_v44 = vpop.f32.mrb[12].mxu1 }
0x1418   :  { %v1481_v45 = vadd.f32 %v2966_v40, %v1480_v44  ;;  %v2460_v46 = vpop.f32.mrb[13].mxu1 }
0x1419   :  { %v3254_v46 = vshrl.u32 %v1764_v42, 7 }
0x141a   :  { %2766 = vtanh.f32 %v1481_v45  ;;  %v2115_v34 = vmul.f32 -1.442695, %v1481_v45 }
0x141b   :  { %2768 = vpow2.f32 %v2118_v0  ;;  %v1938_v0 = vsub.s32 1, %v3254_v46 }
0x141c   :  { %2770 = vpow2.f32 %v2115_v34 }
0x141d   :  { %v2765_v47 = vpop.eup %2764 }
0x141e   :  { %1598 = vrot.lane.b32.xlu1 %v2765_v47, %s2815_s10  ;;  %v1931_v47 = vsub.s32 0, %v3254_v46 }
0x1424   :  { %v2767_v30 = vpop.eup %2766 }
0x1425   :  { %1493 = vrot.lane.b32.xlu0 %v2767_v30, %s2815_s10  ;;  %v2769_v48 = vpop.eup %2768  ;;  %v1945_v30 = vsub.s32 2, %v3254_v46 }
0x1426   :  { %v1592_v49 = vadd.f32 1.0, %v2769_v48  ;;  %v2771_v50 = vpop.eup %2770  ;;  %v1926_v48 = vld [vmem:[%s3307_s1] sm:$0x7f] }
0x1427   :  { %v1487_v51 = vadd.f32 1.0, %v2771_v50  ;;  %v1932_v50 = vrot.slane %v1926_v48, %v1931_v47 }
0x1428   :  { %2772 = vrcp.f32 %v1592_v49  ;;  %v1952_v49 = vsub.s32 3, %v3254_v46 }
0x1429   :  { %2774 = vrcp.f32 %v1487_v51  ;;  %v1939_v51 = vrot.slane %v1926_v48, %v1938_v0 }
0x1432   :  { %v2773_v52 = vpop.eup %2772 }
0x1433   :  { %v2775_v57 = vpop.eup %2774  ;;  %v1596_v60 = vmul.f32 %v2773_v52, %v1396_v23 }
0x1434   :  { %v1491_v62 = vmul.f32 %v2775_v57, %v1291_v28 }
0x1490   :  { %v1599_v54 = vpop.permute.xlu1 %1598 }
0x1491   :  { %v1601_v55 = vmul.f32 %v2773_v52, %v1599_v54 }
0x1493   :  { %1603 = vrot.lane.b32.xlu1 %v1601_v55, %s2816_s11  ;;  %v1946_v55 = vrot.slane %v1926_v48, %v1945_v30 }
0x1497   :  { %v1494_v58 = vpop.permute.xlu0 %1493 }
0x1498   :  { %v1496_v59 = vmul.f32 %v2775_v57, %v1494_v58  ;;  %v1953_v58 = vrot.slane %v1926_v48, %v1952_v49 }
0x149a   :  { %1498 = vrot.lane.b32.xlu0 %v1496_v59, %s2816_s11  ;;  %v1966_v59 = vsub.s32 5, %v3254_v46 }
0x1505   :  { %v1604_v5 = vpop.permute.xlu1 %1603 }
0x1506   :  { %v1606_v61 = vadd.f32 %v1604_v5, %v1596_v60 }
0x1508   :  { %2776 = vtanh.f32 %v1606_v61 }
0x150c   :  { %v1499_v63 = vpop.permute.xlu0 %1498 }
0x150d   :  { %v1501_v1 = vadd.f32 %v1499_v63, %v1491_v62  ;;  %v1973_v62 = vsub.s32 6, %v3254_v46  ;;  %v1967_v63 = vrot.slane %v1926_v48, %v1966_v59 }
0x150f   :  { %2778 = vtanh.f32 %v1501_v1 }
0x1512   :  { %v2777_v2 = vpop.eup %2776 }
0x1513   :  { %1609 = vrot.lane.b32.xlu1 %v2777_v2, %s2815_s10 }
0x1519   :  { %v2779_v3 = vpop.eup %2778 }
0x151a   :  { %1504 = vrot.lane.b32.xlu0 %v2779_v3, %s2815_s10 }
0x1585   :  { %v1610_v7 = vpop.permute.xlu1 %1609 }
0x1586   :  { %v1612_v6 = vmul.f32 %v2773_v52, %v1610_v7  ;;  %v2817_v52 = vmov 1983009808  }
0x1587   :  { %v1762_v54 = vunpack.c.l.s4 %v2817_v52 }
0x1588   :  { %1614 = vrot.lane.b32.xlu0 %v1612_v6, %s2816_s11 }
0x1589   :  { %v1763_v60 = vunpack.c.0.s8 %v1762_v54 }
0x158b   :  { %v3267_v7 = vsub.s32 %v1763_v60, %v3254_v46 }
0x158c   :  { %v1505_v8 = vpop.permute.xlu0 %1504 }
0x158d   :  { %v1507_v9 = vmul.f32 %v2775_v57, %v1505_v8  ;;  %v1959_v57 = vsub.s32 4, %v3254_v46  ;;  %v1974_v8 = vrot.slane %v1926_v48, %v1973_v62 }
0x158f   :  { %1617 = vrot.lane.b32.xlu1 %v1507_v9, %s2815_s10  ;;  %v1960_v61 = vrot.slane %v1926_v48, %v1959_v57 }
0x15fa   :  { %v1615_v10 = vpop.permute.xlu0 %1614 }
0x1601   :  { %v1618_v11 = vpop.permute.xlu1 %1617 }
0x1602   :  { %v1620_v14 = vsel %vm46_vm1, %v1615_v10, %v1618_v11 }
0x1603   :  { %2489 = vmatmul.mubr.msk.f32.vlgmr.msra.gmra.mrb[16].mxu0 %vm150_vm2, %v1620_v14  ;;  %vm2076_vm2 = vcmask 14336  }
0x16d6   :  { %v1690_v15 = vpop.f32.mrb[16].mxu0 }
0x16d7   :  { %v1691_v16 = vadd.f32 %v2966_v40, %v1690_v15  ;;  %v2490_v17 = vpop.f32.mrb[17].mxu0 }
0x16d9   :  { %2780 = vtanh.f32 %v1691_v16  ;;  %v2120_v19 = vmul.f32 -1.442695, %v1691_v16 }
0x16db   :  { %2782 = vpow2.f32 %v2120_v19 }
0x16e3   :  { %v2781_v18 = vpop.eup %2780 }
0x16e4   :  { %1703 = vrot.lane.b32.xlu0 %v2781_v18, %s2815_s10 }
0x16e5   :  { %v2783_v20 = vpop.eup %2782 }
0x16e6   :  { %v1697_v21 = vadd.f32 1.0, %v2783_v20 }
0x16e8   :  { %2784 = vrcp.f32 %v1697_v21 }
0x16f2   :  { %v2785_v22 = vpop.eup %2784 }
0x16f3   :  { %v1701_v40 = vmul.f32 %v2785_v22, %v1501_v1 }
0x1756   :  { %v1704_v23 = vpop.permute.xlu0 %1703 }
0x1757   :  { %v1706_v24 = vmul.f32 %v2785_v22, %v1704_v23 }
0x1759   :  { %1708 = vrot.lane.b32.xlu1 %v1706_v24, %s2816_s11 }
0x175d   :  { %249 = vrot.lane.b32.xlu1 %v2982_v12, %s2816_s11 }
0x1761   :  { %669 = vrot.lane.b32.xlu1 %v3067_v33, %s2816_s11 }
0x1765   :  { %1089 = vrot.lane.b32.xlu1 %v3151_v56, %s2816_s11  ;;  %v1724_v56 = vld [vmem:[%s3306_s5] sm:$0xff] }
0x1766   :  { %v2646_v38 = vpack.c.bf16 %v1725_v35, %v1724_v56 }
0x1768   :  { %2647 = vmatprep.subr.bf16.mxu1 %v2646_v38 }
0x1769   :  { %1509 = vrot.lane.b32.xlu1 %v1507_v9, %s2816_s11  ;;  %2649 = vmatpush3.bf16.msra.mxu1 %v2646_v38 }
0x176d   :  { %1934 = vbcast.lane.b32.xlu1 %v1932_v50, 256 }
0x1771   :  { %1948 = vbcast.lane.b32.xlu1 %v1946_v55, 256 }
0x1775   :  { %1962 = vbcast.lane.b32.xlu1 %v1960_v61, 256 }
0x1779   :  { %1976 = vbcast.lane.b32.xlu1 %v1974_v8, 256 }
0x17cb   :  { %v1709_v26 = vpop.permute.xlu1 %1708 }
0x17cc   :  { %v1711_v28 = vadd.f32 %v1709_v26, %v1701_v40 }
0x17ce   :  { %2786 = vtanh.f32 %v1711_v28 }
0x17cf   :  { %v250_v29 = vpop.permute.xlu1 %249 }
0x17d0   :  { %253 = vst.msk [vmem:[#allocation2] sm:$0x3] %vm252_vm3, %v250_v29 }
0x17d3   :  { %v670_v31 = vpop.permute.xlu1 %669 }
0x17d4   :  { %673 = vst.msk [vmem:[#allocation2 + $0x4] sm:$0x3] %vm252_vm3, %v670_v31  ;;  %v2121_v31 = vld [vmem:[%s3308_s6] ss:$0 sm:$0xff] }
0x17d7   :  { %v1090_v12 = vpop.permute.xlu1 %1089  ;;  %v1728_v43 = vld [vmem:[#allocation2] sm:$0x3] }
0x17d8   :  { %v2787_v32 = vpop.eup %2786  ;;  %1093 = vst.msk [vmem:[#allocation2 + $0x8] sm:$0x3] %vm252_vm3, %v1090_v12 }
0x17d9   :  { %1714 = vrot.lane.b32.xlu0 %v2787_v32, %s2815_s10 }
0x17db   :  { %v1510_v33 = vpop.permute.xlu1 %1509  ;;  %v1730_v45 = vld [vmem:[#allocation2 + $0x4] sm:$0x3] }
0x17dc   :  { %1513 = vst.msk [vmem:[#allocation2 + $0xc] sm:$0x3] %vm252_vm3, %v1510_v33 }
0x17dd   :  { %459 = vrot.lane.b32.xlu0 %v3025_v53, %s2816_s11  ;;  %v1727_v53 = vld [vmem:[%s3306_s5 + $0x18] sm:$0xff] }
0x17df   :  { %v1732_v17 = vld [vmem:[#allocation2 + $0x8] sm:$0x3]  ;;  %v1935_v38 = vpop.permute.xlu1 %1934 }
0x17e1   :  { %879 = vrot.lane.b32.xlu0 %v3109_v13, %s2816_s11  ;;  %v2650_v13 = vpack.c.bf16 %v1727_v53, %v1726_v36 }
0x17e3   :  { %2651 = vmatprep.subr.bf16.mxu1 %v2650_v13  ;;  %v1734_v18 = vld [vmem:[#allocation2 + $0xc] sm:$0x3] }
0x17e4   :  { %2653 = vmatpush3.bf16.msra.mxu1 %v2650_v13 }
0x17e5   :  { %1299 = vrot.lane.b32.xlu0 %v3186_v37, %s2816_s11 }
0x184b   :  { %v1715_v37 = vpop.permute.xlu0 %1714 }
0x184c   :  { %v1717_v39 = vmul.f32 %v2785_v22, %v1715_v37 }
0x184e   :  { %1719 = vrot.lane.b32.xlu0 %v1717_v39, %s2816_s11 }
0x184f   :  { %v460_v41 = vpop.permute.xlu0 %459 }
0x1850   :  { %463 = vst.msk [vmem:[#allocation2 + $0x2] sm:$0x3] %vm252_vm3, %v460_v41  ;;  %v1949_v41 = vpop.permute.xlu1 %1948 }
0x1852   :  { %1941 = vbcast.lane.b32.xlu0 %v1939_v51, 256 }
0x1853   :  { %v880_v25 = vpop.permute.xlu0 %879 }
0x1854   :  { %883 = vst.msk [vmem:[#allocation2 + $0x6] sm:$0x3] %vm252_vm3, %v880_v25 }
0x1856   :  { %1955 = vbcast.lane.b32.xlu0 %v1953_v58, 256 }
0x1857   :  { %v1300_v27 = vpop.permute.xlu0 %1299  ;;  %v1729_v44 = vld [vmem:[#allocation2 + $0x2] sm:$0x3] }
0x1858   :  { %1303 = vst.msk [vmem:[#allocation2 + $0xa] sm:$0x3] %vm252_vm3, %v1300_v27  ;;  %2788 = vtanh.f32 %v1729_v44  ;;  %v1963_v27 = vpop.permute.xlu1 %1962 }
0x1859   :  { %2790 = vtanh.f32 %v1728_v43  ;;  %v1928_v43 = vand.u32 127, %v1764_v42 }
0x185a   :  { %2792 = vtanh.f32 %v1730_v45  ;;  %1969 = vbcast.lane.b32.xlu0 %v1967_v63, 256 }
0x185b   :  { %v1731_v34 = vld [vmem:[#allocation2 + $0x6] sm:$0x3]  ;;  %vm1978_vm4 = vcmp.eq.s32.totalorder %v1928_v43, %v1935_v38  ;;  %vm1980_vm6 = vcmp.eq.s32.totalorder %v1928_v43, %v1949_v41  ;;  %vm1982_vm7 = vcmp.eq.s32.totalorder %v1928_v43, %v1963_v27 }
0x185c   :  { %2794 = vtanh.f32 %v1731_v34  ;;  %v2126_v30 = vsel %vm1978_vm4, 1.0, %v2814_v4  ;;  %v1977_v34 = vpop.permute.xlu1 %1976  ;;  %v2128_v50 = vsel %vm1980_vm6, 1.0, %v2814_v4  ;;  %v2130_v57 = vsel %vm1982_vm7, 1.0, %v2814_v4 }
0x185d   :  { %vm1984_vm10 = vcmp.eq.s32.totalorder %v1928_v43, %v1977_v34 }
0x185f   :  { %v1733_v16 = vld [vmem:[#allocation2 + $0xa] sm:$0x3] }
0x1860   :  { %2796 = vtanh.f32 %v1733_v16 }
0x1861   :  { %2798 = vtanh.f32 %v1732_v17 }
0x1862   :  { %v2789_v5 = vpop.eup %2788  ;;  %2800 = vtanh.f32 %v1734_v18 }
0x1863   :  { %v2791_v1 = vpop.eup %2790 }
0x1864   :  { %v2793_v2 = vpop.eup %2792  ;;  %v1759_v3 = vcombine.low %v2791_v1, %v2789_v5 }
0x1866   :  { %v2795_v6 = vpop.eup %2794  ;;  %v1767_v10 = vrot.slane %v1759_v3, %v3267_v7  ;;  %v2132_v3 = vsel %vm1984_vm10, 1.0, %v2814_v4 }
0x1867   :  { %v1760_v9 = vcombine.low %v2793_v2, %v2795_v6 }
0x1869   :  { %v1774_v11 = vrot.slane %v1760_v9, %v3267_v7 }
0x186a   :  { %v2797_v20 = vpop.eup %2796 }
0x186b   :  { %v1775_v14 = vcombine.low %v1767_v10, %v1774_v11  ;;  %v2799_v21 = vpop.eup %2798 }
0x186c   :  { %v2801_v22 = vpop.eup %2800  ;;  %v1776_v23 = vcombine.low %v2799_v21, %v2797_v20 }
0x186d   :  { %2499 = vmatprep.mubr.msk.f32.mxu1 %vm46_vm1, %v1775_v14 }
0x186e   :  { %v1784_v26 = vrot.slane %v1776_v23, %v3267_v7 }
0x18c0   :  { %v1720_v15 = vpop.permute.xlu0 %1719 }
0x18c1   :  { %1723 = vst.msk [vmem:[#allocation2 + $0xe] sm:$0x3] %vm252_vm3, %v1720_v15 }
0x18c4   :  { %v1942_v25 = vpop.permute.xlu0 %1941 }
0x18c5   :  { %vm1979_vm5 = vcmp.eq.s32.totalorder %v1928_v43, %v1942_v25 }
0x18c6   :  { %v2127_v0 = vsel %vm1979_vm5, 1.0, %v2814_v4 }
0x18c8   :  { %v1735_v19 = vld [vmem:[#allocation2 + $0xe] sm:$0x3]  ;;  %v1956_v44 = vpop.permute.xlu0 %1955 }
0x18c9   :  { %2802 = vtanh.f32 %v1735_v19  ;;  %vm1981_vm8 = vcmp.eq.s32.totalorder %v1928_v43, %v1956_v44  ;;  %v2037_v19 = vsub.s32 %v1928_v43, %v3254_v46 }
0x18ca   :  { %v2129_v62 = vsel %vm1981_vm8, 1.0, %v2814_v4 }
0x18cc   :  { %v1970_v58 = vpop.permute.xlu0 %1969 }
0x18cd   :  { %vm1983_vm11 = vcmp.eq.s32.totalorder %v1928_v43, %v1970_v58 }
0x18ce   :  { %v2131_v10 = vsel %vm1983_vm11, 1.0, %v2814_v4 }
0x18d3   :  { %v2803_v24 = vpop.eup %2802 }
0x18d4   :  { %v1777_v40 = vcombine.low %v2801_v22, %v2803_v24 }
0x18d6   :  { %v1791_v28 = vrot.slane %v1777_v40, %v3267_v7 }
0x18d8   :  { %v1792_v29 = vcombine.low %v1784_v26, %v1791_v28 }
0x18da   :  { %2500 = vmatmul.mubr.msk.f32.vlgmr.msra.gmra.mrb[14].mxu1 %vm46_vm1, %v1792_v29  ;;  %vm2073_vm1 = vcmask 1046534  }
0x19ad   :  { %v2501_v12 = vpop.f32.mrb[14].mxu1 }
0x19ae   :  { %v1869_v32 = vadd.f32 %v2501_v12, %v2121_v31  ;;  %v1863_v33 = vpop.f32.mrb[15].mxu1 }
0x19af   :  { %v1864_v56 = vadd.f32 %v2121_v31, %v1863_v33 }
0x19b0   :  { %v2125_v35 = vmul.f32 -1.442695, %v1869_v32 }
0x19b1   :  { %v2124_v36 = vmul.f32 -1.442695, %v1864_v56 }
0x19b2   :  { %2804 = vpow2.f32 %v2125_v35 }
0x19b3   :  { %2806 = vpow2.f32 %v2124_v36 }
0x19bc   :  { %v2805_v53 = vpop.eup %2804 }
0x19bd   :  { %v2807_v13 = vpop.eup %2806  ;;  %v1879_v37 = vadd.f32 1.0, %v2805_v53 }
0x19be   :  { %v1878_v39 = vadd.f32 1.0, %v2807_v13 }
0x19bf   :  { %2808 = vrcp.f32 %v1879_v37 }
0x19c0   :  { %2810 = vrcp.f32 %v1878_v39 }
0x19c9   :  { %v2809_v45 = vpop.eup %2808 }
0x19ca   :  { %v2811_v47 = vpop.eup %2810  ;;  %v1910_v42 = vrot.slane %v2809_v45, %v3267_v7  ;;  %v1903_v55 = vcombine.high %v2809_v45, %v2809_v45 }
0x19cb   :  { %v1893_v48 = vrot.slane %v2811_v47, %v3267_v7  ;;  %v1886_v49 = vcombine.high %v2811_v47, %v2811_v47 }
0x19cc   :  { %v2003_v1 = vmul.f32 %v2130_v57, %v1910_v42  ;;  %v1917_v2 = vrot.slane %v1903_v55, %v3267_v7  ;;  %v1918_v9 = vcombine.high %v1910_v42, %v1910_v42 }
0x19cd   :  { %v1999_v51 = vmul.f32 %v2126_v30, %v1893_v48  ;;  %v1901_v52 = vcombine.high %v1893_v48, %v1893_v48  ;;  %v1900_v54 = vrot.slane %v1886_v49, %v3267_v7 }
0x19ce   :  { %v2019_v11 = vsel %vm2006_vm9, %v2003_v1, 0.0  ;;  %v2005_v14 = vmul.f32 %v2132_v3, %v1917_v2  ;;  %v2004_v16 = vmul.f32 %v2131_v10, %v1918_v9 }
0x19cf   :  { %v2007_v59 = vsel %vm2006_vm9, %v1999_v51, 0.0  ;;  %v2000_v60 = vmul.f32 %v2127_v0, %v1901_v52  ;;  %v2001_v5 = vmul.f32 %v2128_v50, %v1900_v54  ;;  %v1902_v61 = vcombine.high %v1900_v54, %v1900_v54 }
0x19d0   :  { %2008 = vadd.xlane.f32.xlu0 %v2007_v59  ;;  %v2025_v7 = vsel %vm2006_vm9, %v2005_v14, 0.0  ;;  %v2022_v17 = vsel %vm2006_vm9, %v2004_v16, 0.0 }
0x19d1   :  { %v2010_v63 = vsel %vm2006_vm9, %v2000_v60, 0.0  ;;  %v2013_v6 = vsel %vm2006_vm9, %v2001_v5, 0.0  ;;  %v2002_v8 = vmul.f32 %v2129_v62, %v1902_v61 }
0x19d2   :  { %2011 = vadd.xlane.f32.xlu1 %v2010_v63 }
0x19d3   :  { %v2016_v15 = vsel %vm2006_vm9, %v2002_v8, 0.0 }
0x19d4   :  { %2014 = vadd.xlane.f32.xlu0 %v2013_v6 }
0x19d6   :  { %2020 = vadd.xlane.f32.xlu1 %v2019_v11 }
0x19d8   :  { %2017 = vadd.xlane.f32.xlu0 %v2016_v15 }
0x19da   :  { %2026 = vadd.xlane.f32.xlu1 %v2025_v7 }
0x19dc   :  { %2023 = vadd.xlane.f32.xlu0 %v2022_v17 }
0x1a5d   :  { %v2009_v18 = vpop.xlane.xlu0 %2008 }
0x1a5e   :  { %v2038_v22 = vrot.slane %v2009_v18, %v2037_v19 }
0x1a5f   :  { %v2012_v20 = vpop.xlane.xlu1 %2011 }
0x1a60   :  { %v2042_v4 = vrot.slane %v2012_v20, %v2037_v19 }
0x1a61   :  { %v2015_v21 = vpop.xlane.xlu0 %2014 }
0x1a62   :  { %v2046_v23 = vrot.slane %v2015_v21, %v2037_v19  ;;  %v2064_v40 = vsel %vm2063_vm12, %v2042_v4, %v2038_v22 }
0x1a63   :  { %v2021_v24 = vpop.xlane.xlu1 %2020 }
0x1a64   :  { %v2066_v29 = vsel %vm2065_vm13, %v2046_v23, %v2064_v40  ;;  %v2054_v32 = vrot.slane %v2021_v24, %v2037_v19 }
0x1a65   :  { %v2018_v26 = vpop.xlane.xlu0 %2017 }
0x1a66   :  { %v2050_v28 = vrot.slane %v2018_v26, %v2037_v19 }
0x1a67   :  { %v2027_v12 = vpop.xlane.xlu1 %2026 }
0x1a68   :  { %v2068_v31 = vsel %vm2067_vm14, %v2050_v28, %v2066_v29  ;;  %v2062_v56 = vrot.slane %v2027_v12, %v2037_v19 }
0x1a69   :  { %v2024_v33 = vpop.xlane.xlu0 %2023  ;;  %v2070_v35 = vsel %vm2069_vm15, %v2054_v32, %v2068_v31 }
0x1a6a   :  { %v2058_v46 = vrot.slane %v2024_v33, %v2037_v19 }
0x1a6c   :  { %v2072_v36 = vsel %vm2071_vm0, %v2058_v46, %v2070_v35 }
0x1a6d   :  { %v2074_v38 = vsel %vm2073_vm1, %v2062_v56, %v2072_v36 }
0x1a6e   :  { %2077 = vst.msk [vmem:[%s3309_s7] sm:$0x7f] %vm2076_vm2, %v2074_v38 }

</bundles_post_ra>
